<compile_context>
chip_gen: v6e
topology: v6e:2x2x1
jax: 0.10.0
libtpu: 0.0.40
codegen_flags: <defaults>
</compile_context>

<pallas_src>
import math
import jax
import jax.numpy as jnp
from jax import lax
from jax.experimental import pallas as pl
from jax.experimental.pallas import tpu as pltpu


EGNN_LAYER_DIM = 64


def _full_spec(shape):
    # full-array block (satisfies the (8,128) rule via "equal to full dims")
    return pl.BlockSpec(shape, lambda i: (0,) * len(shape))


# --------------------------------------------------------------------------
# Single fused kernel: reduction + gather + PairwiseMixing + both MLP heads.
# --------------------------------------------------------------------------
def _fused_kernel(h_ref, idx_ref, w_ref, b_ref, out_ref):
    bf = jnp.bfloat16
    f32 = jnp.float32

    h = h_ref[...].astype(f32)                       # (N, D, M)
    N, D, M = h.shape
    P = idx_ref.shape[0] // 2
    Dh = D // 2
    Dq = D // 4

    # Point-axis reduction (sum, and mean = sum * 1/M).  Last-axis reduce on the
    # VMEM-resident block; tiny shapes, XLU cost is negligible and it avoids any
    # wrapper-side transpose / extra HBM traffic.
    h_sum = jnp.sum(h, axis=-1)                      # (N, D) f32
    h_mean_bf = (h_sum * (1.0 / M)).astype(bf)       # (N, D) bf16

    # Fused one-hot gather of BOTH pair endpoints in one MXU pass:
    #   rows 0:P  -> h_mean[idx1],  rows P:2P -> h_mean[idx2].
    # Precondition: 0 <= idx < N (out-of-range rows silently gather zeros,
    # unlike PyTorch advanced indexing which would raise).
    iota_n = lax.broadcasted_iota(jnp.int32, (2 * P, N), 1)
    g = (idx_ref[...] == iota_n).astype(f32).astype(bf)          # (2P, N), exact 0/1
    hcat = jnp.dot(g, h_mean_bf, preferred_element_type=f32)     # (2P, D)
    hswap = pltpu.roll(hcat, shift=P, axis=0)                    # [idx2 rows ; idx1 rows]
    # rows 0:P = x_ab = [h1|h2], rows P:2P = x_ba = [h2|h1]
    x12 = jnp.concatenate([hcat, hswap], axis=-1).astype(bf)     # (2P, 2D)

    # PairwiseMixing, both orderings stacked -> single K=2D matmul per layer.
    w1 = w_ref[0:2 * D, :]                                       # (2D, D) bf16
    pre = jnp.dot(x12, w1, preferred_element_type=f32) + b_ref[0:1, :]
    act = jnp.maximum(pre, 0.2 * pre)                            # LeakyReLU(0.2)
    w2 = w_ref[2 * D:3 * D, :]                                   # (D, D) bf16
    mix = jnp.dot(act.astype(bf), w2, preferred_element_type=f32)
    mixed = mix[:P, :] + mix[P:, :] + b_ref[1:2, :]              # bias row 1 = 2*b2

    # Fused MLP tails: rows 0:P = pairwise head input, rows P:P+N = mol head input.
    # Weights are packed column-wise ([w3|m3], [w4|m4]) so each layer is ONE MXU
    # pass for both heads; the relevant lane-half is selected per row block.
    a = jnp.concatenate([mixed, h_sum], axis=0)                  # (P+N, D) f32
    rows = lax.broadcasted_iota(jnp.int32, (P + N, 1), 0)
    is_pair = rows < P                                           # (P+N, 1) bool

    w3m3 = w_ref[3 * D:4 * D, :]                                 # [w3 | m3]  (D, D)
    pre3 = jnp.dot(a.astype(bf), w3m3, preferred_element_type=f32) + b_ref[2:3, :]
    act3 = jnp.maximum(pre3, 0.2 * pre3)                         # (P+N, D)
    a3 = jnp.where(is_pair, act3[:, :Dh], act3[:, Dh:])          # (P+N, D/2)

    w4m4 = w_ref[4 * D:4 * D + Dh, 0:Dh]                         # [w4 | m4]  (D/2, D/2)
    pre4 = jnp.dot(a3.astype(bf), w4m4, preferred_element_type=f32) + b_ref[3:4, 0:Dh]
    act4 = jnp.maximum(pre4, 0.2 * pre4)                         # (P+N, D/2)
    a4 = jnp.where(is_pair, act4[:, :Dq], act4[:, Dq:Dh])        # (P+N, D/4)

    # Merged final (D/4 -> 1) projections: VPU multiply + short lane reduce
    # (one pass for both heads) instead of two >99%-empty MXU passes.
    proj = jnp.where(is_pair, b_ref[4:5, 0:Dq], b_ref[5:6, 0:Dq])    # (P+N, D/4)
    bias5 = jnp.where(is_pair, b_ref[6:7, 0:1], b_ref[7:8, 0:1])     # (P+N, 1)
    out_ref[...] = jnp.sum(a4 * proj, axis=-1, keepdims=True) + bias5


def fused_heads(h_reshaped, idx1, idx2, w_slab, b_slab):
    N, D, M = h_reshaped.shape
    P = int(idx1.shape[0])
    idx = jnp.concatenate([jnp.asarray(idx1), jnp.asarray(idx2)]
                          ).astype(jnp.int32).reshape(2 * P, 1)
    args = (h_reshaped, idx, w_slab, b_slab)
    out = pl.pallas_call(
        _fused_kernel,
        grid=(1,),
        in_specs=[_full_spec(a.shape) for a in args],
        out_specs=_full_spec((P + N, 1)),
        out_shape=jax.ShapeDtypeStruct((P + N, 1), jnp.float32),
        compiler_params=pltpu.CompilerParams(dimension_semantics=("arbitrary",)),
    )(*args)
    return out[:P], out[P:]


# --------------------------------------------------------------------------
# Parameter initialization (deterministic, mimics nn.Linear default scale).
# Weights stored as (in_features, out_features) so activations do x @ W.
# --------------------------------------------------------------------------
def _linear_params(key, fan_in, fan_out):
    kw, kb = jax.random.split(key)
    bound = 1.0 / math.sqrt(fan_in)
    w = jax.random.uniform(kw, (fan_in, fan_out), jnp.float32, -bound, bound)
    b = jax.random.uniform(kb, (1, fan_out), jnp.float32, -bound, bound)
    return w, b


class ModelPointCloudSwitchedPallas:
    """Pallas port of the module-local compute of Model_Point_Cloud_Switched
    (predict_pairwise_properties=True, predict_mol_property=True)."""

    def __init__(self, key, EGNN_layer_dim=EGNN_LAYER_DIM):
        D = EGNN_layer_dim
        self.D = D
        keys = jax.random.split(key, 8)
        # PairwiseMixing: Linear(2D->D), LeakyReLU(0.2), Linear(D->D)
        w1, b1 = _linear_params(keys[0], 2 * D, D)
        w2, b2 = _linear_params(keys[1], D, D)
        # PairwisePropertyPredictor: Linear(D->D/2), LReLU, Linear(D/2->D/4), LReLU, Linear(D/4->1)
        w3, b3 = _linear_params(keys[2], D, D // 2)
        w4, b4 = _linear_params(keys[3], D // 2, D // 4)
        w5, b5 = _linear_params(keys[4], D // 4, 1)
        self.pairwise_params = (w1, b1, w2, b2, w3, b3, w4, b4, w5, b5)
        # MolPropertyPredictor: Linear(D->D/2), LReLU, Linear(D/2->D/4), LReLU, Linear(D/4->1)
        m3, c3 = _linear_params(keys[5], D, D // 2)
        m4, c4 = _linear_params(keys[6], D // 2, D // 4)
        m5, c5 = _linear_params(keys[7], D // 4, 1)
        self.mol_params = (m3, c3, m4, c4, m5, c5)

        def _pad_cols(x, width):
            return jnp.pad(x, ((0, 0), (0, width - x.shape[1])))

        # One bf16 weight slab (rows: W1 | W2 | [w3|m3] | [w4|m4]) and one f32
        # bias/projection slab -> 2 DMA descriptors instead of ~18 tiny ones.
        self.w_slab = jnp.concatenate([
            w1,                                            # rows 0   : 2D
            w2,                                            # rows 2D  : 3D
            jnp.concatenate([w3, m3], axis=1),             # rows 3D  : 4D
            _pad_cols(jnp.concatenate([w4, m4], axis=1), D),  # rows 4D : 4D+D/2
        ], axis=0).astype(jnp.bfloat16)                    # (4.5*D, D)

        rowpad = lambda v: _pad_cols(jnp.reshape(v, (1, -1)), D)
        self.b_slab = jnp.concatenate([
            rowpad(b1),                                    # row 0
            rowpad(2.0 * b2),                              # row 1 (pre-folded 2*b2)
            rowpad(jnp.concatenate([b3, c3], axis=1)),     # row 2
            rowpad(jnp.concatenate([b4, c4], axis=1)),     # row 3
            rowpad(w5),                                    # row 4 (final pairwise proj)
            rowpad(m5),                                    # row 5 (final mol proj)
            rowpad(b5),                                    # row 6
            rowpad(c5),                                    # row 7
        ], axis=0).astype(jnp.float32)                     # (8, D)

    def forward(self, h_reshaped, pairwise_indices_1_select, pairwise_indices_2_select):
        pairwise_properties_out, mol_property_out = fused_heads(
            h_reshaped, pairwise_indices_1_select, pairwise_indices_2_select,
            self.w_slab, self.b_slab)
        return pairwise_properties_out, mol_property_out


# --------------------------------------------------------------------------
# Pure-JAX f32 reference (mirrors the PyTorch math) for a numerical check.
# --------------------------------------------------------------------------
def _lrelu(x):
    return jnp.maximum(x, 0.2 * x)


def _ref_forward(model, h_reshaped, idx1, idx2):
    w1, b1, w2, b2, w3, b3, w4, b4, w5, b5 = model.pairwise_params
    m3, c3, m4, c4, m5, c5 = model.mol_params
    h_mean = h_reshaped.mean(-1)
    h_sum = h_reshaped.sum(-1)

    def mixing(x):
        return _lrelu(x @ w1 + b1) @ w2 + b2

    xab = jnp.concatenate([h_mean[idx1], h_mean[idx2]], axis=1)
    xba = jnp.concatenate([h_mean[idx2], h_mean[idx1]], axis=1)
    mixed = mixing(xab) + mixing(xba)
    pw = _lrelu(_lrelu(mixed @ w3 + b3) @ w4 + b4) @ w5 + b5
    mp = _lrelu(_lrelu(h_sum @ m3 + c3) @ m4 + c4) @ m5 + c5
    return pw, mp


if __name__ == "__main__":
    key = jax.random.PRNGKey(0)
    k_h, k_i1, k_i2, k_model = jax.random.split(key, 4)

    N_mol, D, n_points, n_pairs = 8, EGNN_LAYER_DIM, 16, 8
    h_reshaped = jax.random.normal(k_h, (N_mol, D, n_points), dtype=jnp.float32)
    idx1 = jax.random.randint(k_i1, (n_pairs,), 0, N_mol)
    idx2 = jax.random.randint(k_i2, (n_pairs,), 0, N_mol)

    model = ModelPointCloudSwitchedPallas(k_model)

    pairwise_out, mol_out = model.forward(h_reshaped, idx1, idx2)
    pairwise_out = jax.block_until_ready(pairwise_out)
    mol_out = jax.block_until_ready(mol_out)

    assert pairwise_out.shape == (n_pairs, 1)
    assert mol_out.shape == (N_mol, 1)

    # Reference is pure f32; kernel uses bf16 matmul inputs (f32 accumulation),
    # so the Pallas output is not bit-comparable -- allow a small tolerance.
    ref_pw, ref_mp = _ref_forward(model, h_reshaped, idx1, idx2)
    assert jnp.allclose(pairwise_out, ref_pw, rtol=5e-2, atol=5e-2), (
        float(jnp.max(jnp.abs(pairwise_out - ref_pw))))
    assert jnp.allclose(mol_out, ref_mp, rtol=5e-2, atol=5e-2), (
        float(jnp.max(jnp.abs(mol_out - ref_mp))))

    print("KERNEL_OK")
</pallas_src>

<mosaic_0001>
module attributes {stable_mosaic.version = 11 : i64} {
  func.func @_fused_kernel(%arg0: i32, %arg1: memref<8x64x16xf32, #tpu.memory_space<vmem>>, %arg2: memref<16x1xi32, #tpu.memory_space<vmem>>, %arg3: memref<288x64xbf16, #tpu.memory_space<vmem>>, %arg4: memref<8x64xf32, #tpu.memory_space<vmem>>, %arg5: memref<16x1xf32, #tpu.memory_space<vmem>>) attributes {dimension_semantics = [#tpu.dimension_semantics<arbitrary>], iteration_bounds = array<i64: 1>, scalar_prefetch = 0 : i64, scratch_operands = 0 : i64, tpu.core_type = #tpu.core_type<tc>, window_params = [{pipeline_mode = #tpu.pipeline_mode<synchronous>, transform_indices = @transform_0, window_bounds = array<i64: 8, 64, 16>}, {pipeline_mode = #tpu.pipeline_mode<synchronous>, transform_indices = @transform_1, window_bounds = array<i64: 16, 1>}, {pipeline_mode = #tpu.pipeline_mode<synchronous>, transform_indices = @transform_2, window_bounds = array<i64: 288, 64>}, {pipeline_mode = #tpu.pipeline_mode<synchronous>, transform_indices = @transform_3, window_bounds = array<i64: 8, 64>}, {pipeline_mode = #tpu.pipeline_mode<synchronous>, transform_indices = @transform_4, window_bounds = array<i64: 16, 1>}]} {
    %c0 = arith.constant 0 : index
    %c0_0 = arith.constant 0 : index
    %c0_1 = arith.constant 0 : index
    %0 = vector.load %arg1[%c0, %c0_0, %c0_1] : memref<8x64x16xf32, #tpu.memory_space<vmem>>, vector<8x64x16xf32>
    %cst = arith.constant dense<0.000000e+00> : vector<8x64xf32>
    %1 = vector.multi_reduction <add>, %0, %cst [2] : vector<8x64x16xf32> to vector<8x64xf32>
    %cst_2 = arith.constant 6.250000e-02 : f32
    %2 = vector.broadcast %cst_2 : f32 to vector<8x64xf32>
    %3 = arith.mulf %1, %2 : vector<8x64xf32>
    %4 = arith.truncf %3 : vector<8x64xf32> to vector<8x64xbf16>
    %5 = tpu.iota {dimensions = array<i32: 1>} : vector<16x8xi32>
    %c0_3 = arith.constant 0 : index
    %c0_4 = arith.constant 0 : index
    %6 = vector.load %arg2[%c0_3, %c0_4] : memref<16x1xi32, #tpu.memory_space<vmem>>, vector<16x1xi32>
    %7 = vector.broadcast %6 : vector<16x1xi32> to vector<16x8xi32>
    %8 = arith.cmpi eq, %7, %5 : vector<16x8xi32>
    %9 = arith.extui %8 : vector<16x8xi1> to vector<16x8xi32>
    %10 = arith.sitofp %9 : vector<16x8xi32> to vector<16x8xf32>
    %11 = arith.truncf %10 : vector<16x8xf32> to vector<16x8xbf16>
    %cst_5 = arith.constant dense<0.000000e+00> : vector<16x64xf32>
    %12 = tpu.matmul %11, %4, %cst_5 {dimension_numbers = #tpu.dot_dimension_numbers<[1], [0], [0], [1], [0, 0, 1, 1], [], []>} : vector<16x8xbf16>, vector<8x64xbf16>, vector<16x64xf32> -> vector<16x64xf32>
    %c8_i32 = arith.constant 8 : i32
    %13 = tpu.dynamic_rotate %12 by %c8_i32 dim 0 : vector<16x64xf32>, i32 -> vector<16x64xf32>
    %14 = tpu.concatenate %12, %13 in 1 : vector<16x64xf32>, vector<16x64xf32> -> vector<16x128xf32>
    %15 = arith.truncf %14 : vector<16x128xf32> to vector<16x128xbf16>
    %c0_6 = arith.constant 0 : index
    %c0_7 = arith.constant 0 : index
    %16 = vector.load %arg3[%c0_6, %c0_7] : memref<288x64xbf16, #tpu.memory_space<vmem>>, vector<128x64xbf16>
    %cst_8 = arith.constant dense<0.000000e+00> : vector<16x64xf32>
    %17 = tpu.matmul %15, %16, %cst_8 {dimension_numbers = #tpu.dot_dimension_numbers<[1], [0], [0], [1], [0, 0, 1, 1], [], []>} : vector<16x128xbf16>, vector<128x64xbf16>, vector<16x64xf32> -> vector<16x64xf32>
    %c0_9 = arith.constant 0 : index
    %c0_10 = arith.constant 0 : index
    %18 = vector.load %arg4[%c0_9, %c0_10] : memref<8x64xf32, #tpu.memory_space<vmem>>, vector<1x64xf32>
    %19 = vector.broadcast %18 : vector<1x64xf32> to vector<16x64xf32>
    %20 = arith.addf %17, %19 : vector<16x64xf32>
    %cst_11 = arith.constant 2.000000e-01 : f32
    %21 = vector.broadcast %cst_11 : f32 to vector<16x64xf32>
    %22 = arith.mulf %21, %20 : vector<16x64xf32>
    %23 = arith.maximumf %20, %22 : vector<16x64xf32>
    %c128 = arith.constant 128 : index
    %c0_12 = arith.constant 0 : index
    %24 = vector.load %arg3[%c128, %c0_12] : memref<288x64xbf16, #tpu.memory_space<vmem>>, vector<64x64xbf16>
    %25 = arith.truncf %23 : vector<16x64xf32> to vector<16x64xbf16>
    %cst_13 = arith.constant dense<0.000000e+00> : vector<16x64xf32>
    %26 = tpu.matmul %25, %24, %cst_13 {dimension_numbers = #tpu.dot_dimension_numbers<[1], [0], [0], [1], [0, 0, 1, 1], [], []>} : vector<16x64xbf16>, vector<64x64xbf16>, vector<16x64xf32> -> vector<16x64xf32>
    %27 = vector.extract_strided_slice %26 {offsets = [0, 0], sizes = [8, 64], strides = [1, 1]} : vector<16x64xf32> to vector<8x64xf32>
    %28 = vector.extract_strided_slice %26 {offsets = [8, 0], sizes = [8, 64], strides = [1, 1]} : vector<16x64xf32> to vector<8x64xf32>
    %29 = arith.addf %27, %28 : vector<8x64xf32>
    %c1 = arith.constant 1 : index
    %c0_14 = arith.constant 0 : index
    %30 = vector.load %arg4[%c1, %c0_14] : memref<8x64xf32, #tpu.memory_space<vmem>>, vector<1x64xf32>
    %31 = vector.broadcast %30 : vector<1x64xf32> to vector<8x64xf32>
    %32 = arith.addf %29, %31 : vector<8x64xf32>
    %33 = tpu.concatenate %32, %1 in 0 : vector<8x64xf32>, vector<8x64xf32> -> vector<16x64xf32>
    %34 = tpu.iota {dimensions = array<i32: 0>} : vector<16x1xi32>
    %c8_i32_15 = arith.constant 8 : i32
    %35 = vector.broadcast %c8_i32_15 : i32 to vector<16x1xi32>
    %36 = arith.cmpi slt, %34, %35 : vector<16x1xi32>
    %c192 = arith.constant 192 : index
    %c0_16 = arith.constant 0 : index
    %37 = vector.load %arg3[%c192, %c0_16] : memref<288x64xbf16, #tpu.memory_space<vmem>>, vector<64x64xbf16>
    %38 = arith.truncf %33 : vector<16x64xf32> to vector<16x64xbf16>
    %cst_17 = arith.constant dense<0.000000e+00> : vector<16x64xf32>
    %39 = tpu.matmul %38, %37, %cst_17 {dimension_numbers = #tpu.dot_dimension_numbers<[1], [0], [0], [1], [0, 0, 1, 1], [], []>} : vector<16x64xbf16>, vector<64x64xbf16>, vector<16x64xf32> -> vector<16x64xf32>
    %c2 = arith.constant 2 : index
    %c0_18 = arith.constant 0 : index
    %40 = vector.load %arg4[%c2, %c0_18] : memref<8x64xf32, #tpu.memory_space<vmem>>, vector<1x64xf32>
    %41 = vector.broadcast %40 : vector<1x64xf32> to vector<16x64xf32>
    %42 = arith.addf %39, %41 : vector<16x64xf32>
    %cst_19 = arith.constant 2.000000e-01 : f32
    %43 = vector.broadcast %cst_19 : f32 to vector<16x64xf32>
    %44 = arith.mulf %43, %42 : vector<16x64xf32>
    %45 = arith.maximumf %42, %44 : vector<16x64xf32>
    %46 = vector.extract_strided_slice %45 {offsets = [0, 0], sizes = [16, 32], strides = [1, 1]} : vector<16x64xf32> to vector<16x32xf32>
    %47 = vector.extract_strided_slice %45 {offsets = [0, 32], sizes = [16, 32], strides = [1, 1]} : vector<16x64xf32> to vector<16x32xf32>
    %48 = vector.shape_cast %36 : vector<16x1xi1> to vector<16x1xi1>
    %49 = vector.broadcast %48 : vector<16x1xi1> to vector<16x32xi1>
    %50 = arith.select %49, %46, %47 : vector<16x32xi1>, vector<16x32xf32>
    %c256 = arith.constant 256 : index
    %c0_20 = arith.constant 0 : index
    %51 = vector.load %arg3[%c256, %c0_20] : memref<288x64xbf16, #tpu.memory_space<vmem>>, vector<32x32xbf16>
    %52 = arith.truncf %50 : vector<16x32xf32> to vector<16x32xbf16>
    %cst_21 = arith.constant dense<0.000000e+00> : vector<16x32xf32>
    %53 = tpu.matmul %52, %51, %cst_21 {dimension_numbers = #tpu.dot_dimension_numbers<[1], [0], [0], [1], [0, 0, 1, 1], [], []>} : vector<16x32xbf16>, vector<32x32xbf16>, vector<16x32xf32> -> vector<16x32xf32>
    %c3 = arith.constant 3 : index
    %c0_22 = arith.constant 0 : index
    %54 = vector.load %arg4[%c3, %c0_22] : memref<8x64xf32, #tpu.memory_space<vmem>>, vector<1x32xf32>
    %55 = vector.broadcast %54 : vector<1x32xf32> to vector<16x32xf32>
    %56 = arith.addf %53, %55 : vector<16x32xf32>
    %cst_23 = arith.constant 2.000000e-01 : f32
    %57 = vector.broadcast %cst_23 : f32 to vector<16x32xf32>
    %58 = arith.mulf %57, %56 : vector<16x32xf32>
    %59 = arith.maximumf %56, %58 : vector<16x32xf32>
    %60 = vector.extract_strided_slice %59 {offsets = [0, 0], sizes = [16, 16], strides = [1, 1]} : vector<16x32xf32> to vector<16x16xf32>
    %61 = vector.extract_strided_slice %59 {offsets = [0, 16], sizes = [16, 16], strides = [1, 1]} : vector<16x32xf32> to vector<16x16xf32>
    %62 = vector.shape_cast %36 : vector<16x1xi1> to vector<16x1xi1>
    %63 = vector.broadcast %62 : vector<16x1xi1> to vector<16x16xi1>
    %64 = arith.select %63, %60, %61 : vector<16x16xi1>, vector<16x16xf32>
    %c4 = arith.constant 4 : index
    %c0_24 = arith.constant 0 : index
    %65 = vector.load %arg4[%c4, %c0_24] : memref<8x64xf32, #tpu.memory_space<vmem>>, vector<1x16xf32>
    %c5 = arith.constant 5 : index
    %c0_25 = arith.constant 0 : index
    %66 = vector.load %arg4[%c5, %c0_25] : memref<8x64xf32, #tpu.memory_space<vmem>>, vector<1x16xf32>
    %67 = vector.shape_cast %36 : vector<16x1xi1> to vector<16x1xi1>
    %68 = vector.broadcast %67 : vector<16x1xi1> to vector<16x16xi1>
    %69 = vector.shape_cast %65 : vector<1x16xf32> to vector<1x16xf32>
    %70 = vector.broadcast %69 : vector<1x16xf32> to vector<16x16xf32>
    %71 = vector.shape_cast %66 : vector<1x16xf32> to vector<1x16xf32>
    %72 = vector.broadcast %71 : vector<1x16xf32> to vector<16x16xf32>
    %73 = arith.select %68, %70, %72 : vector<16x16xi1>, vector<16x16xf32>
    %c6 = arith.constant 6 : index
    %c0_26 = arith.constant 0 : index
    %74 = vector.load %arg4[%c6, %c0_26] : memref<8x64xf32, #tpu.memory_space<vmem>>, vector<1x1xf32>
    %c7 = arith.constant 7 : index
    %c0_27 = arith.constant 0 : index
    %75 = vector.load %arg4[%c7, %c0_27] : memref<8x64xf32, #tpu.memory_space<vmem>>, vector<1x1xf32>
    %76 = vector.shape_cast %74 : vector<1x1xf32> to vector<1x1xf32>
    %77 = vector.broadcast %76 : vector<1x1xf32> to vector<16x1xf32>
    %78 = vector.shape_cast %75 : vector<1x1xf32> to vector<1x1xf32>
    %79 = vector.broadcast %78 : vector<1x1xf32> to vector<16x1xf32>
    %80 = arith.select %36, %77, %79 : vector<16x1xi1>, vector<16x1xf32>
    %81 = arith.mulf %64, %73 : vector<16x16xf32>
    %cst_28 = arith.constant dense<0.000000e+00> : vector<16xf32>
    %82 = vector.multi_reduction <add>, %81, %cst_28 [1] : vector<16x16xf32> to vector<16xf32>
    %83 = vector.shape_cast %82 : vector<16xf32> to vector<16x1xf32>
    %84 = arith.addf %83, %80 : vector<16x1xf32>
    %c0_29 = arith.constant 0 : index
    %c0_30 = arith.constant 0 : index
    %85 = vector.load %arg5[%c0_29, %c0_30] : memref<16x1xf32, #tpu.memory_space<vmem>>, vector<16x1xf32>
    tpu.vector_store %arg5[%c0_29, %c0_30], %84 {strides = array<i32>} : memref<16x1xf32, #tpu.memory_space<vmem>>, vector<16x1xf32>,
    return
  }
  func.func @transform_0(%arg0: i32) -> (i32, i32, i32) {
    %c0_i32 = arith.constant 0 : i32
    %c0_i32_0 = arith.constant 0 : i32
    %c0_i32_1 = arith.constant 0 : i32
    %c0_i32_2 = arith.constant 0 : i32
    return %c0_i32, %c0_i32_0, %c0_i32_1 : i32, i32, i32
  }
  func.func @transform_1(%arg0: i32) -> (i32, i32) {
    %c0_i32 = arith.constant 0 : i32
    %c0_i32_0 = arith.constant 0 : i32
    %c0_i32_1 = arith.constant 0 : i32
    return %c0_i32, %c0_i32_0 : i32, i32
  }
  func.func @transform_2(%arg0: i32) -> (i32, i32) {
    %c0_i32 = arith.constant 0 : i32
    %c0_i32_0 = arith.constant 0 : i32
    %c0_i32_1 = arith.constant 0 : i32
    return %c0_i32, %c0_i32_0 : i32, i32
  }
  func.func @transform_3(%arg0: i32) -> (i32, i32) {
    %c0_i32 = arith.constant 0 : i32
    %c0_i32_0 = arith.constant 0 : i32
    %c0_i32_1 = arith.constant 0 : i32
    return %c0_i32, %c0_i32_0 : i32, i32
  }
  func.func @transform_4(%arg0: i32) -> (i32, i32) {
    %c0_i32 = arith.constant 0 : i32
    %c0_i32_0 = arith.constant 0 : i32
    %c0_i32_1 = arith.constant 0 : i32
    return %c0_i32, %c0_i32_0 : i32, i32
  }
}

</mosaic_0001>

<bundles_post_ra>
// kernel: tpu_custom_call.1
= control target key start
LH: loop header
LB: loop body
LE: loop exit
PB: predicated region body
PF: predicated region fallthrough
CT: control target
= control target key end

     0   :  { %vm82_vm0 = vcmask 130048   ;;  %v1840_v30 = vmov 0   ;;  %vm493_vm1 = vcmask 130112   ;;  %vm500_vm2 = vcmask 195712   ;;  %s1843_s7 = smov 64   ;;  %s1844_s30 = smov 96   ;;  %s2622_s0 = inlined_call_operand.vmem [shape: f32[8,64,16], index: 0, kind: input, shape index: {}]   ;;  %s2623_s1 = inlined_call_operand.vmem [shape: s32[16,1], index: 1, kind: input, shape index: {}]   ;;  %s2624_s2 = inlined_call_operand.vmem [shape: bf16[288,64], index: 2, kind: input, shape index: {}]   ;;  %s2625_s3 = inlined_call_operand.vmem [shape: f32[8,64], index: 3, kind: input, shape index: {}]   ;;  %s2626_s4 = inlined_call_operand.vmem [shape: f32[16,1], index: 4, kind: output, shape index: {}]  }
   0x1   :  { %v26_v0 = vld [vmem:[%s2622_s0 + $0x40] sm:$0xff]  ;;  %v27_v2 = vld [vmem:[%s2622_s0 + $0x48] sm:$0xff]  ;;  %v21_v8 = vld [vmem:[%s2622_s0 + $0x18] sm:$0xff]  ;;  %1816 = vset.pattern.permute.xlu1 %v1840_v30  ;;  %1815 = vset.pattern.permute.xlu0 %v1840_v30  ;;  %vm507_vm3 = vcmask 261312   ;;  %vm1842_vm4 = vmmov 0   ;;  %vm514_vm5 = vcmask 326912  }
   0x2   :  { %v18_v1 = vld [vmem:[%s2622_s0] sm:$0xff]  ;;  %v107_v3 = vsel %vm82_vm0, %v26_v0, 0.0  ;;  %v19_v5 = vld [vmem:[%s2622_s0 + $0x8] sm:$0xff]  ;;  %v110_v6 = vsel %vm82_vm0, %v27_v2, 0.0  ;;  %v20_v9 = vld [vmem:[%s2622_s0 + $0x10] sm:$0xff]  ;;  %v92_v10 = vsel %vm82_vm0, %v21_v8, 0.0 }
   0x3   :  { %v83_v4 = vsel %vm82_vm0, %v18_v1, 0.0  ;;  %108 = vadd.xlane.f32.xlu1 %v107_v3  ;;  %v86_v7 = vsel %vm82_vm0, %v19_v5, 0.0  ;;  %v89_v11 = vsel %vm82_vm0, %v20_v9, 0.0  ;;  %v29_v12 = vld [vmem:[%s2622_s0 + $0x58] sm:$0xff]  ;;  %v28_v13 = vld [vmem:[%s2622_s0 + $0x50] sm:$0xff]  ;;  %v35_v16 = vld [vmem:[%s2622_s0 + $0x88] sm:$0xff] }
   0x4   :  { %84 = vadd.xlane.f32.xlu0 %v83_v4  ;;  %v116_v14 = vsel %vm82_vm0, %v29_v12, 0.0  ;;  %v113_v15 = vsel %vm82_vm0, %v28_v13, 0.0  ;;  %v34_v17 = vld [vmem:[%s2622_s0 + $0x80] sm:$0xff]  ;;  %v134_v18 = vsel %vm82_vm0, %v35_v16, 0.0  ;;  %v37_v20 = vld [vmem:[%s2622_s0 + $0x98] sm:$0xff]  ;;  %v36_v21 = vld [vmem:[%s2622_s0 + $0x90] sm:$0xff] }
   0x5   :  { %v131_v19 = vsel %vm82_vm0, %v34_v17, 0.0  ;;  %v140_v22 = vsel %vm82_vm0, %v37_v20, 0.0  ;;  %v137_v23 = vsel %vm82_vm0, %v36_v21, 0.0  ;;  %v43_v24 = vld [vmem:[%s2622_s0 + $0xc8] sm:$0xff]  ;;  %v42_v25 = vld [vmem:[%s2622_s0 + $0xc0] sm:$0xff]  ;;  %v45_v37 = vld [vmem:[%s2622_s0 + $0xd8] sm:$0xff] }
   0x6   :  { %v158_v26 = vsel %vm82_vm0, %v43_v24, 0.0  ;;  %v155_v27 = vsel %vm82_vm0, %v42_v25, 0.0  ;;  %v23_v28 = vld [vmem:[%s2622_s0 + $0x28] sm:$0xff]  ;;  %v22_v29 = vld [vmem:[%s2622_s0 + $0x20] sm:$0xff]  ;;  %v44_v38 = vld [vmem:[%s2622_s0 + $0xd0] sm:$0xff]  ;;  %v164_v39 = vsel %vm82_vm0, %v45_v37, 0.0 }
   0x7   :  { %111 = vadd.xlane.f32.xlu1 %v110_v6  ;;  %v98_v31 = vsel %vm82_vm0, %v23_v28, 0.0  ;;  %v95_v32 = vsel %vm82_vm0, %v22_v29, 0.0  ;;  %v31_v33 = vld [vmem:[%s2622_s0 + $0x68] sm:$0xff]  ;;  %v30_v34 = vld [vmem:[%s2622_s0 + $0x60] sm:$0xff]  ;;  %v161_v40 = vsel %vm82_vm0, %v44_v38, 0.0  ;;  %v53_v49 = vld [vmem:[%s2622_s0 + $0x118] sm:$0xff] }
   0x8   :  { %87 = vadd.xlane.f32.xlu0 %v86_v7  ;;  %v122_v35 = vsel %vm82_vm0, %v31_v33, 0.0  ;;  %v119_v36 = vsel %vm82_vm0, %v30_v34, 0.0  ;;  %v51_v41 = vld [vmem:[%s2622_s0 + $0x108] sm:$0xff]  ;;  %v50_v42 = vld [vmem:[%s2622_s0 + $0x100] sm:$0xff]  ;;  %v52_v50 = vld [vmem:[%s2622_s0 + $0x110] sm:$0xff]  ;;  %v188_v51 = vsel %vm82_vm0, %v53_v49, 0.0 }
   0x9   :  { %v182_v43 = vsel %vm82_vm0, %v51_v41, 0.0  ;;  %v179_v44 = vsel %vm82_vm0, %v50_v42, 0.0  ;;  %v39_v45 = vld [vmem:[%s2622_s0 + $0xa8] sm:$0xff]  ;;  %v38_v46 = vld [vmem:[%s2622_s0 + $0xa0] sm:$0xff]  ;;  %v185_v52 = vsel %vm82_vm0, %v52_v50, 0.0  ;;  %v25_v57 = vld [vmem:[%s2622_s0 + $0x38] sm:$0xff] }
   0xa   :  { %v146_v47 = vsel %vm82_vm0, %v39_v45, 0.0  ;;  %v143_v48 = vsel %vm82_vm0, %v38_v46, 0.0  ;;  %v59_v53 = vld [vmem:[%s2622_s0 + $0x148] sm:$0xff]  ;;  %v58_v54 = vld [vmem:[%s2622_s0 + $0x140] sm:$0xff]  ;;  %v24_v58 = vld [vmem:[%s2622_s0 + $0x30] sm:$0xff]  ;;  %v104_v59 = vsel %vm82_vm0, %v25_v57, 0.0 }
   0xb   :  { %93 = vadd.xlane.f32.xlu1 %v92_v10  ;;  %v206_v55 = vsel %vm82_vm0, %v59_v53, 0.0  ;;  %v203_v56 = vsel %vm82_vm0, %v58_v54, 0.0  ;;  %v101_v60 = vsel %vm82_vm0, %v24_v58, 0.0  ;;  %v33_v61 = vld [vmem:[%s2622_s0 + $0x78] sm:$0xff]  ;;  %v32_v62 = vld [vmem:[%s2622_s0 + $0x70] sm:$0xff]  ;;  %v47_v1 = vld [vmem:[%s2622_s0 + $0xe8] sm:$0xff] }
   0xc   :  { %90 = vadd.xlane.f32.xlu0 %v89_v11  ;;  %v128_v63 = vsel %vm82_vm0, %v33_v61, 0.0  ;;  %v125_v0 = vsel %vm82_vm0, %v32_v62, 0.0  ;;  %v46_v2 = vld [vmem:[%s2622_s0 + $0xe0] sm:$0xff]  ;;  %v170_v3 = vsel %vm82_vm0, %v47_v1, 0.0  ;;  %v61_v5 = vld [vmem:[%s2622_s0 + $0x158] sm:$0xff]  ;;  %v60_v6 = vld [vmem:[%s2622_s0 + $0x150] sm:$0xff]  ;;  %v371_v1 = vlaneseq }
   0xd   :  { %v167_v4 = vsel %vm82_vm0, %v46_v2, 0.0  ;;  %v212_v7 = vsel %vm82_vm0, %v61_v5, 0.0  ;;  %v209_v8 = vsel %vm82_vm0, %v60_v6, 0.0  ;;  %v67_v9 = vld [vmem:[%s2622_s0 + $0x188] sm:$0xff]  ;;  %v66_v10 = vld [vmem:[%s2622_s0 + $0x180] sm:$0xff]  ;;  %v41_v13 = vld [vmem:[%s2622_s0 + $0xb8] sm:$0xff] }
   0xe   :  { %v230_v11 = vsel %vm82_vm0, %v67_v9, 0.0  ;;  %v227_v12 = vsel %vm82_vm0, %v66_v10, 0.0  ;;  %v55_v17 = vld [vmem:[%s2622_s0 + $0x128] sm:$0xff]  ;;  %v69_v21 = vld [vmem:[%s2622_s0 + $0x198] sm:$0xff]  ;;  %v48_v30 = vld [vmem:[%s2622_s0 + $0xf0] sm:$0xff]  ;;  %v2127_v2 = vand.u32 127, %v371_v1 }
   0xf   :  { %117 = vadd.xlane.f32.xlu1 %v116_v14  ;;  %v40_v14 = vld [vmem:[%s2622_s0 + $0xb0] sm:$0xff]  ;;  %v75_v25 = vld [vmem:[%s2622_s0 + $0x1c8] sm:$0xff]  ;;  %v49_v29 = vld [vmem:[%s2622_s0 + $0xf8] sm:$0xff]  ;;  %vm521_vm6 = vcmask 392512   ;;  %vm528_vm7 = vcmask 458112   ;;  %vm535_vm8 = vcmask 523712  }
  0x10   :  { %114 = vadd.xlane.f32.xlu0 %v113_v15  ;;  %v152_v15 = vsel %vm82_vm0, %v41_v13, 0.0  ;;  %v149_v16 = vsel %vm82_vm0, %v40_v14, 0.0  ;;  %v63_v33 = vld [vmem:[%s2622_s0 + $0x168] sm:$0xff]  ;;  %v62_v34 = vld [vmem:[%s2622_s0 + $0x160] sm:$0xff]  ;;  %v77_v37 = vld [vmem:[%s2622_s0 + $0x1d8] sm:$0xff]  ;;  %v502_v10 = vadd.s32 4294967272, %v2127_v2 }
  0x11   :  { %v76_v38 = vld [vmem:[%s2622_s0 + $0x1d0] sm:$0xff]  ;;  %v57_v41 = vld [vmem:[%s2622_s0 + $0x138] sm:$0xff]  ;;  %v71_v45 = vld [vmem:[%s2622_s0 + $0x1a8] sm:$0xff]  ;;  %vm810_vm9 = vcmask 1041409   ;;  %vm812_vm10 = vcmask 1042434   ;;  %vm814_vm11 = vcmask 1043459  }
  0x12   :  { %v56_v42 = vld [vmem:[%s2622_s0 + $0x130] sm:$0xff]  ;;  %v70_v46 = vld [vmem:[%s2622_s0 + $0x1a0] sm:$0xff]  ;;  %v65_v49 = vld [vmem:[%s2622_s0 + $0x178] sm:$0xff]  ;;  %vm816_vm12 = vcmask 1044484   ;;  %vm818_vm13 = vcmask 1045509   ;;  %vm820_vm14 = vcmask 1046534  }
  0x13   :  { %135 = vadd.xlane.f32.xlu1 %v134_v18  ;;  %v54_v18 = vld [vmem:[%s2622_s0 + $0x120] sm:$0xff]  ;;  %v64_v50 = vld [vmem:[%s2622_s0 + $0x170] sm:$0xff]  ;;  %v79_v53 = vld [vmem:[%s2622_s0 + $0x1e8] sm:$0xff]  ;;  %vm822_vm15 = vcmask 1047559   ;;  %s1845_s6 = smov 112  }
  0x14   :  { %132 = vadd.xlane.f32.xlu0 %v131_v19  ;;  %v194_v19 = vsel %vm82_vm0, %v55_v17, 0.0  ;;  %v191_v20 = vsel %vm82_vm0, %v54_v18, 0.0  ;;  %v78_v54 = vld [vmem:[%s2622_s0 + $0x1e0] sm:$0xff]  ;;  %v73_v57 = vld [vmem:[%s2622_s0 + $0x1b8] sm:$0xff]  ;;  %v72_v58 = vld [vmem:[%s2622_s0 + $0x1b0] sm:$0xff] }
  0x15   :  { %v81_v61 = vld [vmem:[%s2622_s0 + $0x1f8] sm:$0xff]  ;;  %v80_v62 = vld [vmem:[%s2622_s0 + $0x1f0] sm:$0xff]  ;;  %v374_v9 = vld [vmem:[%s2623_s1 + $0x8] sm:$0xff] }
  0x17   :  { %141 = vadd.xlane.f32.xlu1 %v140_v22  ;;  %v68_v22 = vld [vmem:[%s2622_s0 + $0x190] sm:$0xff] }
  0x18   :  { %138 = vadd.xlane.f32.xlu0 %v137_v23  ;;  %v236_v23 = vsel %vm82_vm0, %v69_v21, 0.0  ;;  %v233_v24 = vsel %vm82_vm0, %v68_v22, 0.0  ;;  %v1841_v22 = vmov 0.0  }
  0x19   :  { %1751 = vmatprep.subr.bf16.mxu0 %v1841_v22  ;;  %1757 = vmatprep.subr.bf16.mxu1 %v1841_v22 }
  0x1a   :  { %1753 = vmatprep.mubr.msk.bf16.mxu0 %vm1842_vm4, %v1841_v22  ;;  %1773 = vmatprep.mubr.msk.bf16.mxu1 %vm1842_vm4, %v1841_v22 }
  0x1b   :  { %159 = vadd.xlane.f32.xlu1 %v158_v26  ;;  %v74_v26 = vld [vmem:[%s2622_s0 + $0x1c0] sm:$0xff] }
  0x1c   :  { %156 = vadd.xlane.f32.xlu0 %v155_v27  ;;  %v254_v27 = vsel %vm82_vm0, %v75_v25, 0.0  ;;  %v251_v28 = vsel %vm82_vm0, %v74_v26, 0.0  ;;  %v373_v25 = vld [vmem:[%s2623_s1] sm:$0xff] }
  0x1f   :  { %99 = vadd.xlane.f32.xlu1 %v98_v31  ;;  %v176_v31 = vsel %vm82_vm0, %v49_v29, 0.0 }
  0x20   :  { %96 = vadd.xlane.f32.xlu0 %v95_v32  ;;  %v173_v32 = vsel %vm82_vm0, %v48_v30, 0.0 }
  0x23   :  { %123 = vadd.xlane.f32.xlu1 %v122_v35  ;;  %v218_v35 = vsel %vm82_vm0, %v63_v33, 0.0 }
  0x24   :  { %120 = vadd.xlane.f32.xlu0 %v119_v36  ;;  %v215_v36 = vsel %vm82_vm0, %v62_v34, 0.0 }
  0x27   :  { %165 = vadd.xlane.f32.xlu1 %v164_v39  ;;  %v260_v39 = vsel %vm82_vm0, %v77_v37, 0.0 }
  0x28   :  { %162 = vadd.xlane.f32.xlu0 %v161_v40  ;;  %v257_v40 = vsel %vm82_vm0, %v76_v38, 0.0 }
  0x2b   :  { %183 = vadd.xlane.f32.xlu1 %v182_v43  ;;  %v200_v43 = vsel %vm82_vm0, %v57_v41, 0.0 }
  0x2c   :  { %180 = vadd.xlane.f32.xlu0 %v179_v44  ;;  %v197_v44 = vsel %vm82_vm0, %v56_v42, 0.0 }
  0x2f   :  { %147 = vadd.xlane.f32.xlu1 %v146_v47  ;;  %v242_v47 = vsel %vm82_vm0, %v71_v45, 0.0 }
  0x30   :  { %144 = vadd.xlane.f32.xlu0 %v143_v48  ;;  %v239_v48 = vsel %vm82_vm0, %v70_v46, 0.0 }
  0x33   :  { %189 = vadd.xlane.f32.xlu1 %v188_v51  ;;  %v224_v51 = vsel %vm82_vm0, %v65_v49, 0.0 }
  0x34   :  { %186 = vadd.xlane.f32.xlu0 %v185_v52  ;;  %v221_v52 = vsel %vm82_vm0, %v64_v50, 0.0 }
  0x37   :  { %207 = vadd.xlane.f32.xlu1 %v206_v55  ;;  %v266_v55 = vsel %vm82_vm0, %v79_v53, 0.0 }
  0x38   :  { %204 = vadd.xlane.f32.xlu0 %v203_v56  ;;  %v263_v56 = vsel %vm82_vm0, %v78_v54, 0.0 }
  0x3b   :  { %105 = vadd.xlane.f32.xlu1 %v104_v59  ;;  %v248_v59 = vsel %vm82_vm0, %v73_v57, 0.0 }
  0x3c   :  { %102 = vadd.xlane.f32.xlu0 %v101_v60  ;;  %v245_v60 = vsel %vm82_vm0, %v72_v58, 0.0 }
  0x3f   :  { %129 = vadd.xlane.f32.xlu1 %v128_v63  ;;  %v272_v63 = vsel %vm82_vm0, %v81_v61, 0.0 }
  0x40   :  { %126 = vadd.xlane.f32.xlu0 %v125_v0  ;;  %v269_v0 = vsel %vm82_vm0, %v80_v62, 0.0 }
  0x43   :  { %171 = vadd.xlane.f32.xlu1 %v170_v3  ;;  %v2129_v3 = vshrl.u32 %v371_v1, 7 }
  0x44   :  { %168 = vadd.xlane.f32.xlu0 %v167_v4  ;;  %v488_v4 = vadd.s32 4294967288, %v2127_v2 }
  0x45   :  { %v2134_v5 = vsub.s32 %v2127_v2, %v2129_v3 }
  0x47   :  { %213 = vadd.xlane.f32.xlu1 %v212_v7 }
  0x48   :  { %210 = vadd.xlane.f32.xlu0 %v209_v8  ;;  %v2137_v8 = vsub.s32 %v488_v4, %v2129_v3 }
  0x4b   :  { %231 = vadd.xlane.f32.xlu1 %v230_v11  ;;  %v495_v11 = vadd.s32 4294967280, %v2127_v2 }
  0x4c   :  { %228 = vadd.xlane.f32.xlu0 %v227_v12 }
  0x4f   :  { %153 = vadd.xlane.f32.xlu1 %v152_v15 }
  0x50   :  { %150 = vadd.xlane.f32.xlu0 %v149_v16 }
  0x53   :  { %195 = vadd.xlane.f32.xlu1 %v194_v19 }
  0x54   :  { %192 = vadd.xlane.f32.xlu0 %v191_v20 }
  0x57   :  { %237 = vadd.xlane.f32.xlu1 %v236_v23  ;;  %v2151_v23 = vsub.s32 %v502_v10, %v2129_v3 }
  0x58   :  { %234 = vadd.xlane.f32.xlu0 %v233_v24  ;;  %v2154_v24 = vsub.s32 %v495_v11, %v2129_v3 }
  0x5b   :  { %255 = vadd.xlane.f32.xlu1 %v254_v27 }
  0x5c   :  { %252 = vadd.xlane.f32.xlu0 %v251_v28 }
  0x5f   :  { %177 = vadd.xlane.f32.xlu1 %v176_v31 }
  0x60   :  { %174 = vadd.xlane.f32.xlu0 %v173_v32 }
  0x63   :  { %219 = vadd.xlane.f32.xlu1 %v218_v35 }
  0x64   :  { %216 = vadd.xlane.f32.xlu0 %v215_v36 }
  0x67   :  { %261 = vadd.xlane.f32.xlu1 %v260_v39 }
  0x68   :  { %258 = vadd.xlane.f32.xlu0 %v257_v40 }
  0x6b   :  { %201 = vadd.xlane.f32.xlu1 %v200_v43 }
  0x6c   :  { %198 = vadd.xlane.f32.xlu0 %v197_v44 }
  0x6f   :  { %243 = vadd.xlane.f32.xlu1 %v242_v47 }
  0x70   :  { %240 = vadd.xlane.f32.xlu0 %v239_v48 }
  0x73   :  { %225 = vadd.xlane.f32.xlu1 %v224_v51 }
  0x74   :  { %222 = vadd.xlane.f32.xlu0 %v221_v52 }
  0x77   :  { %267 = vadd.xlane.f32.xlu1 %v266_v55 }
  0x78   :  { %264 = vadd.xlane.f32.xlu0 %v263_v56 }
  0x7b   :  { %249 = vadd.xlane.f32.xlu1 %v248_v59 }
  0x7c   :  { %246 = vadd.xlane.f32.xlu0 %v245_v60 }
  0x7f   :  { %273 = vadd.xlane.f32.xlu1 %v272_v63 }
  0x80   :  { %270 = vadd.xlane.f32.xlu0 %v269_v0 }
  0x8c   :  { %v109_v6 = vpop.xlane.xlu1 %108 }
  0x8d   :  { %v85_v7 = vpop.xlane.xlu0 %84  ;;  %v283_v12 = vmul.f32 0.0625, %v109_v6  ;;  %v1190_v13 = vrot.slane %v109_v6, %v2134_v5 }
  0x8e   :  { %v275_v14 = vmul.f32 0.0625, %v85_v7  ;;  %v1151_v15 = vrot.slane %v85_v7, %v2134_v5 }
  0x90   :  { %v112_v16 = vpop.xlane.xlu1 %111  ;;  %379 = vperm.xlu1 %1816, %v374_v9  }
  0x91   :  { %v88_v17 = vpop.xlane.xlu0 %87  ;;  %v284_v18 = vmul.f32 0.0625, %v112_v16  ;;  %v1194_v19 = vrot.slane %v112_v16, %v2137_v8 }
  0x92   :  { %v276_v20 = vmul.f32 0.0625, %v88_v17  ;;  %v1155_v21 = vrot.slane %v88_v17, %v2137_v8 }
  0x93   :  { %v343_v26 = vpack.c.bf16 %v284_v18, %v283_v12  ;;  %v1195_v27 = vsel %vm493_vm1, %v1194_v19, %v1190_v13  ;;  %v516_v13 = vadd.s32 4294967256, %v2127_v2  ;;  %v509_v18 = vadd.s32 4294967264, %v2127_v2 }
  0x94   :  { %v339_v28 = vpack.c.bf16 %v276_v20, %v275_v14  ;;  %v1156_v29 = vsel %vm493_vm1, %v1155_v21, %v1151_v15  ;;  %v94_v30 = vpop.xlane.xlu1 %93 }
  0x95   :  { %v91_v31 = vpop.xlane.xlu0 %90  ;;  %v428_v34 = vunpack.c.l.b16 %v343_v26  ;;  %v278_v35 = vmul.f32 0.0625, %v94_v30  ;;  %v429_v38 = vunpack.c.h.b16 %v343_v26  ;;  %v1165_v41 = vrot.slane %v94_v30, %v2151_v23 }
  0x96   :  { %v420_v32 = vunpack.c.l.b16 %v339_v28  ;;  %v421_v33 = vunpack.c.h.b16 %v339_v28  ;;  %376 = vperm.xlu0 %1815, %v373_v25   ;;  %v277_v36 = vmul.f32 0.0625, %v91_v31  ;;  %v1160_v37 = vrot.slane %v91_v31, %v2154_v24 }
  0x97   :  { %v540_v52 = vrot.slane %v428_v34, %v2134_v5  ;;  %v544_v53 = vrot.slane %v429_v38, %v2137_v8  ;;  %v2203_v31 = vsub.s32 %v516_v13, %v2129_v3 }
  0x98   :  { %v487_v39 = vrot.slane %v420_v32, %v2134_v5  ;;  %v492_v40 = vrot.slane %v421_v33, %v2137_v8  ;;  %v340_v42 = vpack.c.bf16 %v278_v35, %v277_v36  ;;  %v1161_v43 = vsel %vm500_vm2, %v1160_v37, %v1156_v29  ;;  %v118_v44 = vpop.xlane.xlu1 %117 }
  0x99   :  { %v115_v45 = vpop.xlane.xlu0 %114  ;;  %v286_v46 = vmul.f32 0.0625, %v118_v44  ;;  %v1204_v47 = vrot.slane %v118_v44, %v2151_v23  ;;  %v2176_v55 = vsel %vm507_vm3, %v1165_v41, %v1161_v43  ;;  %v545_v19 = vsel %vm493_vm1, %v544_v53, %v540_v52 }
  0x9a   :  { %v422_v48 = vunpack.c.l.b16 %v340_v42  ;;  %v423_v49 = vunpack.c.h.b16 %v340_v42  ;;  %v285_v50 = vmul.f32 0.0625, %v115_v45  ;;  %v1199_v51 = vrot.slane %v115_v45, %v2154_v24 }
  0x9b   :  { %v494_v54 = vsel %vm493_vm1, %v492_v40, %v487_v39  ;;  %v2208_v37 = vsub.s32 %v509_v18, %v2129_v3 }
  0x9c   :  { %v499_v56 = vrot.slane %v422_v48, %v2154_v24  ;;  %v506_v57 = vrot.slane %v423_v49, %v2151_v23  ;;  %v344_v58 = vpack.c.bf16 %v286_v46, %v285_v50  ;;  %v1200_v59 = vsel %vm500_vm2, %v1199_v51, %v1195_v27  ;;  %v136_v60 = vpop.xlane.xlu1 %135 }
  0x9d   :  { %v133_v61 = vpop.xlane.xlu0 %132  ;;  %v292_v62 = vmul.f32 0.0625, %v136_v60  ;;  %v1233_v63 = vrot.slane %v136_v60, %v2137_v8  ;;  %v2185_v9 = vsel %vm507_vm3, %v1204_v47, %v1200_v59 }
  0x9e   :  { %v291_v0 = vmul.f32 0.0625, %v133_v61  ;;  %v1229_v1 = vrot.slane %v133_v61, %v2134_v5  ;;  %v501_v4 = vsel %vm500_vm2, %v499_v56, %v494_v54  ;;  %v430_v6 = vunpack.c.l.b16 %v344_v58 }
  0x9f   :  { %v431_v7 = vunpack.c.h.b16 %v344_v58  ;;  %v2188_v10 = vsel %vm507_vm3, %v506_v57, %v501_v4 }
  0xa0   :  { %v347_v11 = vpack.c.bf16 %v292_v62, %v291_v0  ;;  %v1234_v12 = vsel %vm493_vm1, %v1233_v63, %v1229_v1  ;;  %v549_v14 = vrot.slane %v430_v6, %v2154_v24  ;;  %v142_v16 = vpop.xlane.xlu1 %141 }
  0xa1   :  { %v554_v15 = vrot.slane %v431_v7, %v2151_v23  ;;  %v139_v17 = vpop.xlane.xlu0 %138  ;;  %v294_v25 = vmul.f32 0.0625, %v142_v16  ;;  %v1243_v27 = vrot.slane %v142_v16, %v2151_v23 }
  0xa2   :  { %v436_v20 = vunpack.c.l.b16 %v347_v11  ;;  %v437_v21 = vunpack.c.h.b16 %v347_v11  ;;  %v550_v26 = vsel %vm500_vm2, %v549_v14, %v545_v19  ;;  %v293_v28 = vmul.f32 0.0625, %v139_v17 }
  0xa3   :  { %v1238_v29 = vrot.slane %v139_v17, %v2154_v24  ;;  %v2200_v30 = vsel %vm507_vm3, %v554_v15, %v550_v26 }
  0xa4   :  { %v579_v32 = vrot.slane %v436_v20, %v2134_v5  ;;  %v348_v33 = vpack.c.bf16 %v294_v25, %v293_v28  ;;  %v160_v35 = vpop.xlane.xlu1 %159  ;;  %v583_v38 = vrot.slane %v437_v21, %v2137_v8 }
  0xa5   :  { %v1239_v34 = vsel %vm500_vm2, %v1238_v29, %v1234_v12  ;;  %v157_v36 = vpop.xlane.xlu0 %156  ;;  %v300_v39 = vmul.f32 0.0625, %v160_v35  ;;  %v1272_v40 = vrot.slane %v160_v35, %v2137_v8 }
  0xa6   :  { %v299_v41 = vmul.f32 0.0625, %v157_v36  ;;  %v438_v42 = vunpack.c.l.b16 %v348_v33  ;;  %v439_v43 = vunpack.c.h.b16 %v348_v33  ;;  %v1268_v44 = vrot.slane %v157_v36, %v2134_v5 }
  0xa7   :  { %v2214_v45 = vsel %vm507_vm3, %v1243_v27, %v1239_v34  ;;  %v584_v52 = vsel %vm493_vm1, %v583_v38, %v579_v32 }
  0xa8   :  { %v351_v46 = vpack.c.bf16 %v300_v39, %v299_v41  ;;  %v588_v47 = vrot.slane %v438_v42, %v2154_v24  ;;  %v593_v48 = vrot.slane %v439_v43, %v2151_v23  ;;  %v1273_v49 = vsel %vm493_vm1, %v1272_v40, %v1268_v44  ;;  %v100_v50 = vpop.xlane.xlu1 %99 }
  0xa9   :  { %v97_v51 = vpop.xlane.xlu0 %96  ;;  %v280_v53 = vmul.f32 0.0625, %v100_v50  ;;  %v1175_v56 = vrot.slane %v100_v50, %v2203_v31 }
  0xaa   :  { %v589_v54 = vsel %vm500_vm2, %v588_v47, %v584_v52  ;;  %v279_v57 = vmul.f32 0.0625, %v97_v51  ;;  %v1170_v58 = vrot.slane %v97_v51, %v2208_v37  ;;  %v444_v13 = vunpack.c.l.b16 %v351_v46 }
  0xab   :  { %v2224_v59 = vsel %vm507_vm3, %v593_v48, %v589_v54  ;;  %v445_v15 = vunpack.c.h.b16 %v351_v46 }
  0xac   :  { %v341_v60 = vpack.c.bf16 %v280_v53, %v279_v57  ;;  %v1171_v61 = vsel %vm514_vm5, %v1170_v58, %v2176_v55  ;;  %v124_v62 = vpop.xlane.xlu1 %123  ;;  %v618_v35 = vrot.slane %v444_v13, %v2134_v5 }
  0xad   :  { %v121_v63 = vpop.xlane.xlu0 %120  ;;  %v288_v0 = vmul.f32 0.0625, %v124_v62  ;;  %v1214_v1 = vrot.slane %v124_v62, %v2203_v31  ;;  %v2231_v12 = vsel %vm521_vm6, %v1175_v56, %v1171_v61  ;;  %v622_v36 = vrot.slane %v445_v15, %v2137_v8 }
  0xae   :  { %v287_v4 = vmul.f32 0.0625, %v121_v63  ;;  %v424_v6 = vunpack.c.l.b16 %v341_v60  ;;  %v425_v7 = vunpack.c.h.b16 %v341_v60  ;;  %v1209_v11 = vrot.slane %v121_v63, %v2208_v37 }
  0xaf   :  { %v623_v57 = vsel %vm493_vm1, %v622_v36, %v618_v35 }
  0xb0   :  { %v345_v14 = vpack.c.bf16 %v288_v0, %v287_v4  ;;  %v513_v16 = vrot.slane %v424_v6, %v2208_v37  ;;  %v520_v55 = vrot.slane %v425_v7, %v2203_v31  ;;  %v1210_v17 = vsel %vm514_vm5, %v1209_v11, %v2185_v9  ;;  %v166_v18 = vpop.xlane.xlu1 %165 }
  0xb1   :  { %v163_v19 = vpop.xlane.xlu0 %162  ;;  %v302_v25 = vmul.f32 0.0625, %v166_v18  ;;  %v2241_v29 = vsel %vm521_vm6, %v1214_v1, %v1210_v17  ;;  %v1282_v34 = vrot.slane %v166_v18, %v2151_v23  ;;  %v530_v4 = vadd.s32 4294967240, %v2127_v2 }
  0xb2   :  { %v432_v20 = vunpack.c.l.b16 %v345_v14  ;;  %v433_v21 = vunpack.c.h.b16 %v345_v14  ;;  %v515_v26 = vsel %vm514_vm5, %v513_v16, %v2188_v10  ;;  %v301_v27 = vmul.f32 0.0625, %v163_v19 }
  0xb3   :  { %v1277_v28 = vrot.slane %v163_v19, %v2154_v24  ;;  %v2244_v32 = vsel %vm521_vm6, %v520_v55, %v515_v26  ;;  %v523_v6 = vadd.s32 4294967248, %v2127_v2 }
  0xb4   :  { %v559_v33 = vrot.slane %v432_v20, %v2208_v37  ;;  %v564_v9 = vrot.slane %v433_v21, %v2203_v31  ;;  %v352_v10 = vpack.c.bf16 %v302_v25, %v301_v27  ;;  %v184_v39 = vpop.xlane.xlu1 %183  ;;  %v2283_v27 = vsub.s32 %v530_v4, %v2129_v3 }
  0xb5   :  { %v1278_v38 = vsel %vm500_vm2, %v1277_v28, %v1273_v49  ;;  %v181_v40 = vpop.xlane.xlu0 %180  ;;  %v308_v42 = vmul.f32 0.0625, %v184_v39  ;;  %v1311_v43 = vrot.slane %v184_v39, %v2137_v8 }
  0xb6   :  { %v560_v41 = vsel %vm514_vm5, %v559_v33, %v2200_v30  ;;  %v307_v44 = vmul.f32 0.0625, %v181_v40  ;;  %v446_v47 = vunpack.c.l.b16 %v352_v10  ;;  %v447_v48 = vunpack.c.h.b16 %v352_v10 }
  0xb7   :  { %v2256_v46 = vsel %vm521_vm6, %v564_v9, %v560_v41  ;;  %v1307_v50 = vrot.slane %v181_v40, %v2134_v5  ;;  %v2260_v52 = vsel %vm507_vm3, %v1282_v34, %v1278_v38 }
  0xb8   :  { %v355_v51 = vpack.c.bf16 %v308_v42, %v307_v44  ;;  %v627_v49 = vrot.slane %v446_v47, %v2154_v24  ;;  %v632_v53 = vrot.slane %v447_v48, %v2151_v23  ;;  %v148_v54 = vpop.xlane.xlu1 %147 }
  0xb9   :  { %v1312_v30 = vsel %vm493_vm1, %v1311_v43, %v1307_v50  ;;  %v145_v56 = vpop.xlane.xlu0 %144  ;;  %v296_v58 = vmul.f32 0.0625, %v148_v54  ;;  %v1253_v61 = vrot.slane %v148_v54, %v2203_v31 }
  0xba   :  { %v628_v60 = vsel %vm500_vm2, %v627_v49, %v623_v57  ;;  %v295_v62 = vmul.f32 0.0625, %v145_v56  ;;  %v1248_v63 = vrot.slane %v145_v56, %v2208_v37  ;;  %v452_v1 = vunpack.c.l.b16 %v355_v51 }
  0xbb   :  { %v2270_v0 = vsel %vm507_vm3, %v632_v53, %v628_v60  ;;  %v453_v7 = vunpack.c.h.b16 %v355_v51 }
  0xbc   :  { %v349_v11 = vpack.c.bf16 %v296_v58, %v295_v62  ;;  %v1249_v13 = vsel %vm514_vm5, %v1248_v63, %v2214_v45  ;;  %v190_v14 = vpop.xlane.xlu1 %189  ;;  %v657_v25 = vrot.slane %v452_v1, %v2134_v5  ;;  %v2286_v45 = vsub.s32 %v523_v6, %v2129_v3 }
  0xbd   :  { %v187_v15 = vpop.xlane.xlu0 %186  ;;  %v310_v16 = vmul.f32 0.0625, %v190_v14  ;;  %v1321_v55 = vrot.slane %v190_v14, %v2151_v23  ;;  %v2279_v21 = vsel %vm521_vm6, %v1253_v61, %v1249_v13  ;;  %v661_v28 = vrot.slane %v453_v7, %v2137_v8 }
  0xbe   :  { %v309_v17 = vmul.f32 0.0625, %v187_v15  ;;  %v440_v18 = vunpack.c.l.b16 %v349_v11  ;;  %v441_v19 = vunpack.c.h.b16 %v349_v11  ;;  %v1316_v20 = vrot.slane %v187_v15, %v2154_v24 }
  0xbf   :  { %v662_v50 = vsel %vm493_vm1, %v661_v28, %v657_v25 }
  0xc0   :  { %v356_v26 = vpack.c.bf16 %v310_v16, %v309_v17  ;;  %v598_v33 = vrot.slane %v440_v18, %v2208_v37  ;;  %v603_v9 = vrot.slane %v441_v19, %v2203_v31  ;;  %v1317_v34 = vsel %vm500_vm2, %v1316_v20, %v1312_v30  ;;  %v208_v35 = vpop.xlane.xlu1 %207 }
  0xc1   :  { %v205_v36 = vpop.xlane.xlu0 %204  ;;  %v316_v39 = vmul.f32 0.0625, %v208_v35  ;;  %v1350_v40 = vrot.slane %v208_v35, %v2137_v8  ;;  %v2297_v43 = vsel %vm507_vm3, %v1321_v55, %v1317_v34 }
  0xc2   :  { %v454_v10 = vunpack.c.l.b16 %v356_v26  ;;  %v455_v38 = vunpack.c.h.b16 %v356_v26  ;;  %v599_v41 = vsel %vm514_vm5, %v598_v33, %v2224_v59  ;;  %v315_v3 = vmul.f32 0.0625, %v205_v36 }
  0xc3   :  { %v1346_v42 = vrot.slane %v205_v36, %v2134_v5  ;;  %v2300_v44 = vsel %vm521_vm6, %v603_v9, %v599_v41 }
  0xc4   :  { %v666_v47 = vrot.slane %v454_v10, %v2154_v24  ;;  %v671_v48 = vrot.slane %v455_v38, %v2151_v23  ;;  %v2305_v51 = vpack.c.bf16 %v316_v39, %v315_v3  ;;  %v106_v59 = vpop.xlane.xlu1 %105 }
  0xc5   :  { %v1351_v49 = vsel %vm493_vm1, %v1350_v40, %v1346_v42  ;;  %v103_v53 = vpop.xlane.xlu0 %102  ;;  %v282_v54 = vmul.f32 0.0625, %v106_v59  ;;  %v1185_v56 = vrot.slane %v106_v59, %v2283_v27 }
  0xc6   :  { %v667_v30 = vsel %vm500_vm2, %v666_v47, %v662_v50  ;;  %v281_v57 = vmul.f32 0.0625, %v103_v53  ;;  %v1180_v60 = vrot.slane %v103_v53, %v2286_v45 }
  0xc7   :  { %v2311_v58 = vsel %vm507_vm3, %v671_v48, %v667_v30 }
  0xc8   :  { %v342_v61 = vpack.c.bf16 %v282_v54, %v281_v57  ;;  %v1181_v62 = vsel %vm528_vm7, %v1180_v60, %v2231_v12  ;;  %v130_v63 = vpop.xlane.xlu1 %129 }
  0xc9   :  { %v127_v1 = vpop.xlane.xlu0 %126  ;;  %v1186_v6 = vsel %vm535_vm8, %v1185_v56, %v1181_v62  ;;  %v290_v7 = vmul.f32 0.0625, %v130_v63  ;;  %v1224_v11 = vrot.slane %v130_v63, %v2283_v27 }
  0xca   :  { %v426_v4 = vunpack.c.l.b16 %v342_v61  ;;  %v289_v13 = vmul.f32 0.0625, %v127_v1  ;;  %v1219_v14 = vrot.slane %v127_v1, %v2286_v45  ;;  %v427_v15 = vunpack.c.h.b16 %v342_v61 }
  0xcc   :  { %v527_v16 = vrot.slane %v426_v4, %v2286_v45  ;;  %v346_v55 = vpack.c.bf16 %v290_v7, %v289_v13  ;;  %v1220_v17 = vsel %vm528_vm7, %v1219_v14, %v2241_v29  ;;  %v172_v12 = vpop.xlane.xlu1 %171  ;;  %v534_v33 = vrot.slane %v427_v15, %v2283_v27 }
  0xcd   :  { %v169_v18 = vpop.xlane.xlu0 %168  ;;  %v1225_v19 = vsel %vm535_vm8, %v1224_v11, %v1220_v17  ;;  %v1292_v28 = vrot.slane %v172_v12, %v2203_v31  ;;  %v304_v48 = vmul.f32 0.0625, %v172_v12 }
  0xce   :  { %v434_v20 = vunpack.c.l.b16 %v346_v55  ;;  %v435_v25 = vunpack.c.h.b16 %v346_v55  ;;  %v1460_v26 = vsel %vm810_vm9, %v1225_v19, %v1186_v6  ;;  %v1287_v9 = vrot.slane %v169_v18, %v2208_v37 }
  0xcf   :  { %v529_v34 = vsel %vm528_vm7, %v527_v16, %v2244_v32  ;;  %v303_v50 = vmul.f32 0.0625, %v169_v18 }
  0xd0   :  { %v569_v35 = vrot.slane %v434_v20, %v2286_v45  ;;  %v574_v29 = vrot.slane %v435_v25, %v2283_v27  ;;  %v214_v36 = vpop.xlane.xlu1 %213  ;;  %v1288_v38 = vsel %vm514_vm5, %v1287_v9, %v2260_v52  ;;  %v536_v3 = vsel %vm535_vm8, %v534_v33, %v529_v34 }
  0xd1   :  { %v211_v10 = vpop.xlane.xlu0 %210  ;;  %v2337_v41 = vsel %vm521_vm6, %v1292_v28, %v1288_v38  ;;  %v1360_v42 = vrot.slane %v214_v36, %v2151_v23  ;;  %v353_v56 = vpack.c.bf16 %v304_v48, %v303_v50  ;;  %v318_v57 = vmul.f32 0.0625, %v214_v36 }
  0xd2   :  { %v570_v39 = vsel %vm528_vm7, %v569_v35, %v2256_v46  ;;  %v1355_v40 = vrot.slane %v211_v10, %v2154_v24  ;;  %v317_v60 = vmul.f32 0.0625, %v211_v10  ;;  %v461_v33 = vunpack.c.h.b16 %v2305_v51 }
  0xd3   :  { %v575_v32 = vsel %vm535_vm8, %v574_v29, %v570_v39  ;;  %v448_v11 = vunpack.c.l.b16 %v353_v56  ;;  %v449_v9 = vunpack.c.h.b16 %v353_v56 }
  0xd4   :  { %v811_v47 = vsel %vm810_vm9, %v575_v32, %v536_v3  ;;  %v1356_v52 = vsel %vm500_vm2, %v1355_v40, %v1351_v49  ;;  %v232_v59 = vpop.xlane.xlu1 %231  ;;  %v360_v16 = vpack.c.bf16 %v318_v57, %v317_v60 }
  0xd5   :  { %v229_v53 = vpop.xlane.xlu0 %228  ;;  %v1389_v46 = vrot.slane %v232_v59, %v2137_v8  ;;  %v2347_v54 = vsel %vm507_vm3, %v1360_v42, %v1356_v52  ;;  %v637_v34 = vrot.slane %v448_v11, %v2208_v37  ;;  %v642_v56 = vrot.slane %v449_v9, %v2203_v31 }
  0xd6   :  { %v1385_v30 = vrot.slane %v229_v53, %v2134_v5  ;;  %v462_v36 = vunpack.c.l.b16 %v360_v16  ;;  %v323_v39 = vmul.f32 0.0625, %v229_v53  ;;  %v463_v57 = vunpack.c.h.b16 %v360_v16 }
  0xd8   :  { %v154_v61 = vpop.xlane.xlu1 %153  ;;  %v1390_v63 = vsel %vm493_vm1, %v1389_v46, %v1385_v30  ;;  %v638_v30 = vsel %vm514_vm5, %v637_v34, %v2270_v0 }
  0xd9   :  { %v151_v62 = vpop.xlane.xlu0 %150  ;;  %v298_v1 = vmul.f32 0.0625, %v154_v61  ;;  %v1263_v4 = vrot.slane %v154_v61, %v2283_v27 }
  0xda   :  { %v297_v49 = vmul.f32 0.0625, %v151_v62  ;;  %v1258_v6 = vrot.slane %v151_v62, %v2286_v45 }
  0xdc   :  { %v350_v7 = vpack.c.bf16 %v298_v1, %v297_v49  ;;  %v1259_v13 = vsel %vm528_vm7, %v1258_v6, %v2279_v21  ;;  %v196_v14 = vpop.xlane.xlu1 %195  ;;  %v460_v21 = vunpack.c.l.b16 %v2305_v51 }
  0xdd   :  { %v193_v15 = vpop.xlane.xlu0 %192  ;;  %v1264_v12 = vsel %vm535_vm8, %v1263_v4, %v1259_v13  ;;  %v1331_v25 = vrot.slane %v196_v14, %v2203_v31  ;;  %v312_v3 = vmul.f32 0.0625, %v196_v14  ;;  %v643_v14 = vsel %vm521_vm6, %v642_v56, %v638_v30 }
  0xde   :  { %v442_v55 = vunpack.c.l.b16 %v350_v7  ;;  %v443_v17 = vunpack.c.h.b16 %v350_v7  ;;  %v2356_v18 = vsel %vm812_vm10, %v1264_v12, %v1460_v26  ;;  %v1326_v28 = vrot.slane %v193_v15, %v2208_v37 }
  0xdf   :  { %v324_v26 = vmul.f32 0.0625, %v232_v59  ;;  %v311_v32 = vmul.f32 0.0625, %v193_v15  ;;  %v696_v59 = vrot.slane %v460_v21, %v2134_v5  ;;  %v710_v15 = vrot.slane %v463_v57, %v2151_v23 }
  0xe0   :  { %v608_v19 = vrot.slane %v442_v55, %v2286_v45  ;;  %v613_v20 = vrot.slane %v443_v17, %v2283_v27  ;;  %v238_v35 = vpop.xlane.xlu1 %237  ;;  %v1327_v38 = vsel %vm514_vm5, %v1326_v28, %v2297_v43  ;;  %v700_v43 = vrot.slane %v461_v33, %v2137_v8 }
  0xe1   :  { %v235_v29 = vpop.xlane.xlu0 %234  ;;  %v1399_v51 = vrot.slane %v238_v35, %v2151_v23  ;;  %v2373_v48 = vsel %vm521_vm6, %v1331_v25, %v1327_v38  ;;  %v363_v61 = vpack.c.bf16 %v324_v26, %v323_v39  ;;  %v357_v62 = vpack.c.bf16 %v312_v3, %v311_v32 }
  0xe2   :  { %v609_v10 = vsel %vm528_vm7, %v608_v19, %v2300_v44  ;;  %v1394_v42 = vrot.slane %v235_v29, %v2154_v24  ;;  %v326_v4 = vmul.f32 0.0625, %v238_v35  ;;  %v325_v49 = vmul.f32 0.0625, %v235_v29 }
  0xe3   :  { %v614_v40 = vsel %vm535_vm8, %v613_v20, %v609_v10  ;;  %v701_v0 = vsel %vm493_vm1, %v700_v43, %v696_v59  ;;  %v468_v12 = vunpack.c.l.b16 %v363_v61  ;;  %v469_v19 = vunpack.c.h.b16 %v363_v61 }
  0xe4   :  { %v2376_v50 = vsel %vm812_vm10, %v614_v40, %v811_v47  ;;  %v256_v52 = vpop.xlane.xlu1 %255  ;;  %v1395_v53 = vsel %vm500_vm2, %v1394_v42, %v1390_v63  ;;  %v705_v47 = vrot.slane %v462_v36, %v2154_v24  ;;  %v456_v20 = vunpack.c.l.b16 %v357_v62 }
  0xe5   :  { %v253_v44 = vpop.xlane.xlu0 %252  ;;  %v1428_v46 = vrot.slane %v256_v52, %v2137_v8  ;;  %v2388_v1 = vsel %vm507_vm3, %v1399_v51, %v1395_v53  ;;  %v457_v25 = vunpack.c.h.b16 %v357_v62  ;;  %v364_v28 = vpack.c.bf16 %v326_v4, %v325_v49 }
  0xe6   :  { %v1424_v60 = vrot.slane %v253_v44, %v2134_v5  ;;  %v706_v17 = vsel %vm500_vm2, %v705_v47, %v701_v0  ;;  %v332_v35 = vmul.f32 0.0625, %v256_v52  ;;  %v331_v29 = vmul.f32 0.0625, %v253_v44 }
  0xe7   :  { %v735_v3 = vrot.slane %v468_v12, %v2134_v5  ;;  %v676_v32 = vrot.slane %v456_v20, %v2208_v37  ;;  %v739_v42 = vrot.slane %v469_v19, %v2137_v8  ;;  %v681_v57 = vrot.slane %v457_v25, %v2203_v31 }
  0xe8   :  { %v1429_v63 = vsel %vm493_vm1, %v1428_v46, %v1424_v60  ;;  %v178_v6 = vpop.xlane.xlu1 %177  ;;  %v470_v46 = vunpack.c.l.b16 %v364_v28  ;;  %v367_v30 = vpack.c.bf16 %v332_v35, %v331_v29  ;;  %v471_v4 = vunpack.c.h.b16 %v364_v28 }
  0xe9   :  { %v175_v7 = vpop.xlane.xlu0 %174  ;;  %v306_v11 = vmul.f32 0.0625, %v178_v6  ;;  %v1302_v13 = vrot.slane %v178_v6, %v2283_v27  ;;  %v677_v62 = vsel %vm514_vm5, %v676_v32, %v2311_v58 }
  0xea   :  { %v305_v16 = vmul.f32 0.0625, %v175_v7  ;;  %v1297_v55 = vrot.slane %v175_v7, %v2286_v45  ;;  %v740_v7 = vsel %vm493_vm1, %v739_v42, %v735_v3  ;;  %v477_v25 = vunpack.c.h.b16 %v367_v30 }
  0xec   :  { %v354_v21 = vpack.c.bf16 %v306_v11, %v305_v16  ;;  %v1298_v33 = vsel %vm528_vm7, %v1297_v55, %v2337_v41  ;;  %v220_v9 = vpop.xlane.xlu1 %219  ;;  %v476_v16 = vunpack.c.l.b16 %v367_v30 }
  0xed   :  { %v217_v34 = vpop.xlane.xlu0 %216  ;;  %v1303_v36 = vsel %vm535_vm8, %v1302_v13, %v1298_v33  ;;  %v320_v26 = vmul.f32 0.0625, %v220_v9  ;;  %v1370_v51 = vrot.slane %v220_v9, %v2203_v31 }
  0xee   :  { %v450_v10 = vunpack.c.l.b16 %v354_v21  ;;  %v451_v38 = vunpack.c.h.b16 %v354_v21  ;;  %v1462_v39 = vsel %vm814_vm11, %v1303_v36, %v2356_v18  ;;  %v319_v40 = vmul.f32 0.0625, %v217_v34 }
  0xef   :  { %v1365_v41 = vrot.slane %v217_v34, %v2208_v37  ;;  %v711_v18 = vsel %vm507_vm3, %v710_v15, %v706_v17  ;;  %v744_v15 = vrot.slane %v470_v46, %v2154_v24  ;;  %v682_v17 = vsel %vm521_vm6, %v681_v57, %v677_v62 }
  0xf0   :  { %v647_v52 = vrot.slane %v450_v10, %v2286_v45  ;;  %v652_v44 = vrot.slane %v451_v38, %v2283_v27  ;;  %v361_v59 = vpack.c.bf16 %v320_v26, %v319_v40  ;;  %v262_v43 = vpop.xlane.xlu1 %261  ;;  %v774_v26 = vrot.slane %v476_v16, %v2134_v5 }
  0xf1   :  { %v259_v53 = vpop.xlane.xlu0 %258  ;;  %v1366_v56 = vsel %vm514_vm5, %v1365_v41, %v2347_v54  ;;  %v1438_v47 = vrot.slane %v262_v43, %v2151_v23  ;;  %v334_v28 = vmul.f32 0.0625, %v262_v43  ;;  %v745_v36 = vsel %vm500_vm2, %v744_v15, %v740_v7 }
  0xf2   :  { %v648_v60 = vsel %vm528_vm7, %v647_v52, %v643_v14  ;;  %v1433_v61 = vrot.slane %v259_v53, %v2154_v24  ;;  %v1371_v6 = vsel %vm521_vm6, %v1370_v51, %v1366_v56  ;;  %v464_v0 = vunpack.c.l.b16 %v361_v59 }
  0xf3   :  { %v653_v49 = vsel %vm535_vm8, %v652_v44, %v648_v60  ;;  %v333_v21 = vmul.f32 0.0625, %v259_v53  ;;  %v778_v41 = vrot.slane %v477_v25, %v2137_v8 }
  0xf4   :  { %v1434_v54 = vsel %vm500_vm2, %v1433_v61, %v1429_v63  ;;  %v202_v11 = vpop.xlane.xlu1 %201  ;;  %v815_v14 = vsel %vm814_vm11, %v653_v49, %v2376_v50  ;;  %v749_v63 = vrot.slane %v471_v4, %v2151_v23  ;;  %v465_v50 = vunpack.c.h.b16 %v361_v59 }
  0xf5   :  { %v199_v13 = vpop.xlane.xlu0 %198  ;;  %v314_v55 = vmul.f32 0.0625, %v202_v11  ;;  %v1341_v58 = vrot.slane %v202_v11, %v2283_v27  ;;  %v2429_v20 = vsel %vm507_vm3, %v1438_v47, %v1434_v54  ;;  %v715_v33 = vrot.slane %v464_v0, %v2208_v37 }
  0xf6   :  { %v313_v12 = vmul.f32 0.0625, %v199_v13  ;;  %v1336_v19 = vrot.slane %v199_v13, %v2286_v45  ;;  %v368_v42 = vpack.c.bf16 %v334_v28, %v333_v21  ;;  %v720_v59 = vrot.slane %v465_v50, %v2203_v31 }
  0xf7   :  { %v716_v44 = vsel %vm514_vm5, %v715_v33, %v711_v18  ;;  %v750_v61 = vsel %vm507_vm3, %v749_v63, %v745_v36  ;;  %v779_v62 = vsel %vm493_vm1, %v778_v41, %v774_v26 }
  0xf8   :  { %v358_v9 = vpack.c.bf16 %v314_v55, %v313_v12  ;;  %v1337_v34 = vsel %vm528_vm7, %v1336_v19, %v2373_v48  ;;  %v244_v35 = vpop.xlane.xlu1 %243  ;;  %v478_v4 = vunpack.c.l.b16 %v368_v42  ;;  %v721_v15 = vsel %vm521_vm6, %v720_v59, %v716_v44 }
  0xf9   :  { %v241_v29 = vpop.xlane.xlu0 %240  ;;  %v1342_v10 = vsel %vm535_vm8, %v1341_v58, %v1337_v34  ;;  %v328_v38 = vmul.f32 0.0625, %v244_v35  ;;  %v1409_v51 = vrot.slane %v244_v35, %v2203_v31  ;;  %v479_v16 = vunpack.c.h.b16 %v368_v42 }
  0xfa   :  { %v458_v40 = vunpack.c.l.b16 %v358_v9  ;;  %v459_v3 = vunpack.c.h.b16 %v358_v9  ;;  %v1463_v32 = vsel %vm816_vm12, %v1342_v10, %v1462_v39  ;;  %v327_v48 = vmul.f32 0.0625, %v241_v29 }
  0xfb   :  { %v1404_v52 = vrot.slane %v241_v29, %v2208_v37  ;;  %v783_v25 = vrot.slane %v478_v4, %v2154_v24  ;;  %v788_v10 = vrot.slane %v479_v16, %v2151_v23 }
  0xfc   :  { %v686_v5 = vrot.slane %v458_v40, %v2286_v45  ;;  %v691_v43 = vrot.slane %v459_v3, %v2283_v27  ;;  %v226_v53 = vpop.xlane.xlu1 %225  ;;  %v365_v30 = vpack.c.bf16 %v328_v38, %v327_v48 }
  0xfd   :  { %v223_v46 = vpop.xlane.xlu0 %222  ;;  %v1405_v39 = vsel %vm514_vm5, %v1404_v52, %v2388_v1  ;;  %v322_v56 = vmul.f32 0.0625, %v226_v53  ;;  %v1380_v8 = vrot.slane %v226_v53, %v2283_v27 }
  0xfe   :  { %v687_v57 = vsel %vm528_vm7, %v686_v5, %v682_v17  ;;  %v321_v60 = vmul.f32 0.0625, %v223_v46  ;;  %v1375_v18 = vrot.slane %v223_v46, %v2286_v45  ;;  %v1410_v47 = vsel %vm521_vm6, %v1409_v51, %v1405_v39 }
  0xff   :  { %v692_v49 = vsel %vm535_vm8, %v691_v43, %v687_v57  ;;  %v472_v7 = vunpack.c.l.b16 %v365_v30  ;;  %v473_v28 = vunpack.c.h.b16 %v365_v30 }
 0x100   :  { %v362_v0 = vpack.c.bf16 %v322_v56, %v321_v60  ;;  %v1376_v1 = vsel %vm528_vm7, %v1375_v18, %v1371_v6  ;;  %v268_v54 = vpop.xlane.xlu1 %267  ;;  %v817_v13 = vsel %vm816_vm12, %v692_v49, %v815_v14 }
 0x101   :  { %v265_v11 = vpop.xlane.xlu0 %264  ;;  %v1381_v55 = vsel %vm535_vm8, %v1380_v8, %v1376_v1  ;;  %v336_v58 = vmul.f32 0.0625, %v268_v54  ;;  %v1448_v19 = vrot.slane %v268_v54, %v2203_v31  ;;  %v754_v14 = vrot.slane %v472_v7, %v2208_v37 }
 0x102   :  { %v466_v17 = vunpack.c.l.b16 %v362_v0  ;;  %v467_v12 = vunpack.c.h.b16 %v362_v0  ;;  %v335_v63 = vmul.f32 0.0625, %v265_v11  ;;  %v1443_v6 = vrot.slane %v265_v11, %v2208_v37 }
 0x103   :  { %v1464_v21 = vsel %vm818_vm13, %v1381_v55, %v1463_v32  ;;  %v784_v32 = vsel %vm500_vm2, %v783_v25, %v779_v62  ;;  %v759_v51 = vrot.slane %v473_v28, %v2203_v31 }
 0x104   :  { %v725_v50 = vrot.slane %v466_v17, %v2286_v45  ;;  %v730_v33 = vrot.slane %v467_v12, %v2283_v27  ;;  %v369_v9 = vpack.c.bf16 %v336_v58, %v335_v63  ;;  %v250_v34 = vpop.xlane.xlu1 %249  ;;  %v1444_v29 = vsel %vm514_vm5, %v1443_v6, %v2429_v20 }
 0x105   :  { %v247_v35 = vpop.xlane.xlu0 %246  ;;  %v330_v36 = vmul.f32 0.0625, %v250_v34  ;;  %v1419_v24 = vrot.slane %v250_v34, %v2283_v27  ;;  %v1449_v3 = vsel %vm521_vm6, %v1448_v19, %v1444_v29  ;;  %v755_v20 = vsel %vm514_vm5, %v754_v14, %v750_v61  ;;  %v1823_v14 = vld [vmem:[%s2624_s2 + $0x30] sm:$0xff]   ;;  %v1829_v29 = vld [vmem:[%s2624_s2] sm:$0xff]  }
 0x106   :  { %v329_v26 = vmul.f32 0.0625, %v247_v35  ;;  %v480_v38 = vunpack.c.l.b16 %v369_v9  ;;  %v1414_v40 = vrot.slane %v247_v35, %v2286_v45  ;;  %v726_v42 = vsel %vm528_vm7, %v725_v50, %v721_v15  ;;  %v1824_v50 = vld [vmem:[%s2624_s2 + $0x28] sm:$0xff]   ;;  %v1827_v34 = vld [vmem:[%s2624_s2 + $0x10] sm:$0xff]  }
 0x107   :  { %v481_v48 = vunpack.c.h.b16 %v369_v9  ;;  %v731_v23 = vsel %vm535_vm8, %v730_v33, %v726_v42  ;;  %v760_v60 = vsel %vm521_vm6, %v759_v51, %v755_v20  ;;  %v1825_v33 = vld [vmem:[%s2624_s2 + $0x20] sm:$0xff]   ;;  %v1826_v9 = vld [vmem:[%s2624_s2 + $0x18] sm:$0xff]   ;;  %v1828_v35 = vld [vmem:[%s2624_s2 + $0x8] sm:$0xff]  }
 0x108   :  { %v366_v41 = vpack.c.bf16 %v330_v36, %v329_v26  ;;  %v1415_v52 = vsel %vm528_vm7, %v1414_v40, %v1410_v47  ;;  %v274_v44 = vpop.xlane.xlu1 %273  ;;  %v793_v30 = vrot.slane %v480_v38, %v2208_v37  ;;  %v819_v18 = vsel %vm818_vm13, %v731_v23, %v817_v13  ;;  %v1830_v36 = vld [vmem:[%s2624_s2 + $0x58] sm:$0xff]  }
 0x109   :  { %v271_v59 = vpop.xlane.xlu0 %270  ;;  %v1420_v53 = vsel %vm535_vm8, %v1419_v24, %v1415_v52  ;;  %v338_v46 = vmul.f32 0.0625, %v274_v44  ;;  %v1458_v39 = vrot.slane %v274_v44, %v2283_v27  ;;  %v789_v37 = vsel %vm507_vm3, %v788_v10, %v784_v32  ;;  %v1832_v52 = vld [vmem:[%s2624_s2 + $0x48] sm:$0xff]   ;;  %v1833_v44 = vld [vmem:[%s2624_s2 + $0x40] sm:$0xff]  }
 0x10a   :  { %v474_v5 = vunpack.c.l.b16 %v366_v41  ;;  %v475_v43 = vunpack.c.h.b16 %v366_v41  ;;  %v337_v56 = vmul.f32 0.0625, %v271_v59  ;;  %v1453_v8 = vrot.slane %v271_v59, %v2286_v45  ;;  %v1698_v59 = vld [vmem:[%s2625_s3] ss:$0 sm:$0xff] }
 0x10b   :  { %v1465_v4 = vsel %vm820_vm14, %v1420_v53, %v1464_v21  ;;  %v798_v49 = vrot.slane %v481_v48, %v2203_v31  ;;  %v794_v13 = vsel %vm514_vm5, %v793_v30, %v789_v37  ;;  %vm829_vm3 = vcmask 1043456   ;;  %v1831_v48 = vld [vmem:[%s2624_s2 + $0x50] sm:$0xff]  }
 0x10c   :  { %v764_v57 = vrot.slane %v474_v5, %v2286_v45  ;;  %v769_v47 = vrot.slane %v475_v43, %v2283_v27  ;;  %v370_v61 = vpack.c.bf16 %v338_v46, %v337_v56  ;;  %v1454_v62 = vsel %vm528_vm7, %v1453_v8, %v1449_v3  ;;  %v380_v11 = vpop.permute.xlu1 %379 }
 0x10d   :  { %v1459_v0 = vsel %vm535_vm8, %v1458_v39, %v1454_v62  ;;  %vm382_vm1 = vcmp.eq.s32.totalorder %v380_v11, %v2127_v2  ;;  %v799_v31 = vsel %vm521_vm6, %v798_v49, %v794_v13  ;;  %vm825_vm5 = vcmask 64512   ;;  %v1837_v62 = vld [vmem:[%s2624_s2 + $0x60] sm:$0xff]   ;;  %v1838_v13 = vld [vmem:[%s2624_s2 + $0x88] sm:$0xff]  }
 0x10e   :  { %v765_v7 = vsel %vm528_vm7, %v764_v57, %v760_v60  ;;  %v482_v1 = vunpack.c.l.b16 %v370_v61  ;;  %v483_v54 = vunpack.c.h.b16 %v370_v61  ;;  %v2494_v15 = vsel %vm822_vm15, %v1459_v0, %v1465_v4  ;;  %v1834_v60 = vld [vmem:[%s2624_s2 + $0x78] sm:$0xff]   ;;  %v1836_v61 = vld [vmem:[%s2624_s2 + $0x68] sm:$0xff]  }
 0x10f   :  { %v770_v17 = vsel %vm535_vm8, %v769_v47, %v765_v7  ;;  %v1696_v25 = vsel %vm382_vm1, 1.0, %v1841_v22  ;;  %vm882_vm6 = vcmask 523264   ;;  %v1835_v47 = vld [vmem:[%s2624_s2 + $0x70] sm:$0xff]   ;;  %v1712_v7 = vld [vmem:[%s2625_s3 + $0x1] ss:$0 sm:$0xff] }
 0x110   :  { %v803_v16 = vrot.slane %v482_v1, %v2286_v45  ;;  %v808_v55 = vrot.slane %v483_v54, %v2283_v27  ;;  %v821_v63 = vsel %vm820_vm14, %v770_v17, %v819_v18 }
 0x111   :  { %v377_v58 = vpop.permute.xlu0 %376 }
 0x112   :  { %vm381_vm2 = vcmp.eq.s32.totalorder %v377_v58, %v2127_v2  ;;  %v804_v12 = vsel %vm528_vm7, %v803_v16, %v799_v31  ;;  %v1822_v2 = vld [vmem:[%s2624_s2 + $0x38] sm:$0xff]   ;;  %v1839_v16 = vld [vmem:[%s2624_s2 + $0x80] sm:$0xff]   ;;  %vm1688_vm7 = vcmask 7168  }
 0x113   :  { %v809_v19 = vsel %vm535_vm8, %v808_v55, %v804_v12  ;;  %v1695_v45 = vsel %vm381_vm2, 1.0, %v1841_v22  ;;  %1758 = vmatpush3.bf16.msra.mxu1 %v1822_v2  ;;  %v1713_v55 = vld [vmem:[%s2625_s3 + $0x2] ss:$0 sm:$0xff]  ;;  %v1719_v2 = vld [vmem:[%s2625_s3 + $0x3] ss:$0 sm:$0xff] }
 0x114   :  { %v823_v27 = vsel %vm822_vm15, %v809_v19, %v821_v63  ;;  %v387_v6 = vpack.c.bf16 %v1696_v25, %v1695_v45  ;;  %1759 = vmatprep.subr.bf16.mxu1 %v1841_v22 }
 0x115   :  { %v824_v28 = vpack.c.b16 %v823_v27, %v823_v27 }
 0x117   :  { %v831_v21 = vsel %vm829_vm3, %v824_v28, 0  ;;  %1760 = vmatpush3.bf16.msra.mxu1 %v1823_v14 }
 0x118   :  { %1752 = vmatpush3.bf16.msra.mxu0 %v831_v21  ;;  %1761 = vmatprep.subr.bf16.mxu1 %v1841_v22 }
 0x119   :  { %1777 = vmatprep.subr.bf16.mxu0 %v1841_v22 }
 0x11b   :  { %1754 = vmatmul.mubr.msk.bf16.vlgmr.msra.gmra.mxu0 %vm825_vm5, %v387_v6  ;;  %1762 = vmatpush3.bf16.msra.mxu1 %v1824_v50 }
 0x11c   :  { %1785 = vmatprep.mubr.msk.bf16.mxu0 %vm1842_vm4, %v1841_v22  ;;  %1763 = vmatprep.subr.bf16.mxu1 %v1841_v22 }
 0x11d   :  { %1778 = vmatpush3.bf16.msra.mxu0 %v1830_v36 }
 0x11e   :  { %1779 = vmatprep.subr.bf16.mxu0 %v1841_v22 }
 0x11f   :  { %1764 = vmatpush3.bf16.msra.mxu1 %v1825_v33 }
 0x120   :  { %1765 = vmatprep.subr.bf16.mxu1 %v1841_v22 }
 0x121   :  { %1780 = vmatpush3.bf16.msra.mxu0 %v1831_v48 }
 0x122   :  { %1781 = vmatprep.subr.bf16.mxu0 %v1841_v22 }
 0x123   :  { %1766 = vmatpush3.bf16.msra.mxu1 %v1826_v9 }
 0x124   :  { %1767 = vmatprep.subr.bf16.mxu1 %v1841_v22 }
 0x125   :  { %1782 = vmatpush3.bf16.msra.mxu0 %v1832_v52 }
 0x126   :  { %1783 = vmatprep.subr.bf16.mxu0 %v1841_v22 }
 0x127   :  { %1768 = vmatpush3.bf16.msra.mxu1 %v1827_v34 }
 0x128   :  { %1769 = vmatprep.subr.bf16.mxu1 %v1841_v22 }
 0x129   :  { %1784 = vmatpush3.bf16.msra.mxu0 %v1833_v44 }
 0x12a   :  { %1789 = vmatprep.subr.bf16.mxu0 %v1841_v22 }
 0x12b   :  { %1770 = vmatpush3.bf16.msra.mxu1 %v1828_v35 }
 0x12c   :  { %1771 = vmatprep.subr.bf16.mxu1 %v1841_v22 }
 0x12f   :  { %1772 = vmatpush3.bf16.msra.mxu1 %v1829_v29 }
 0x130   :  { %1801 = vmatprep.subr.bf16.mxu1 %v1841_v22 }
 0x1db   :  { %v867_v24 = vpop.f32.mrf.mxu0 }
 0x1dd   :  { %v1755_v26 = vpop.f32.mrf.mxu0 }
 0x1df   :  { %v870_v10 = vpop.f32.mrf.mxu0 }
 0x1e0   :  { %v1817_v38 = vpack.i.bf16 %v867_v24, %v870_v10 }
 0x1e1   :  { %v1756_v40 = vpop.f32.mrf.mxu0 }
 0x1e2   :  { %1818 = vrot.lane.b32.xlu1 %v1817_v38, %s1843_s7  ;;  %v1724_v38 = vld [vmem:[%s2625_s3 + $0x5] ss:$0 sm:$0xff] }
 0x254   :  { %v1819_v3 = vpop.permute.xlu1 %1818 }
 0x255   :  { %v1821_v32 = vunpack.i.h.bf16 %v1819_v3  ;;  %v1820_v51 = vunpack.i.l.bf16 %v1819_v3 }
 0x257   :  { %v883_v41 = vsel %vm882_vm6, %v867_v24, %v1820_v51  ;;  %v884_v42 = vsel %vm882_vm6, %v870_v10, %v1821_v32  ;;  %v1723_v24 = vld [vmem:[%s2625_s3 + $0x4] ss:$0 sm:$0xff]  ;;  %v1725_v51 = vld [vmem:[%s2625_s3 + $0x6] ss:$0 sm:$0xff] }
 0x258   :  { %v885_v20 = vpack.c.bf16 %v884_v42, %v883_v41 }
 0x25a   :  { %1774 = vmatmul.mubr.bf16.vlgmr.msra.gmra.mxu1 %v885_v20  ;;  %v1726_v20 = vld [vmem:[%s2625_s3 + $0x7] ss:$0 sm:$0xff] }
 0x25b   :  { %1805 = vmatprep.mubr.msk.bf16.mxu1 %vm1842_vm4, %v1841_v22  ;;  %1802 = vmatpush3.bf16.msra.mxu1 %v1838_v13 }
 0x25c   :  { %1803 = vmatprep.subr.bf16.mxu1 %v1841_v22 }
 0x25f   :  { %1804 = vmatpush3.bf16.msra.mxu1 %v1839_v16 }
 0x31a   :  { %v989_v23 = vpop.f32.mrf.mxu1 }
 0x31b   :  { %v990_v5 = vadd.f32 %v1698_v59, %v989_v23 }
 0x31c   :  { %v1775_v43 = vpop.f32.mrf.mxu1 }
 0x31d   :  { %v996_v46 = vmul.f32 0.2, %v990_v5 }
 0x31e   :  { %v992_v53 = vpop.f32.mrf.mxu1 }
 0x31f   :  { %v993_v30 = vadd.f32 %v1698_v59, %v992_v53  ;;  %v998_v8 = vmax.f32 %v990_v5, %v996_v46 }
 0x320   :  { %v1776_v39 = vpop.f32.mrf.mxu1 }
 0x321   :  { %v997_v56 = vmul.f32 0.2, %v993_v30 }
 0x323   :  { %v999_v57 = vmax.f32 %v993_v30, %v997_v56 }
 0x325   :  { %v1008_v18 = vpack.c.bf16 %v999_v57, %v998_v8 }
 0x327   :  { %1786 = vmatmul.mubr.msk.bf16.vlgmr.msra.gmra.mxu0 %vm882_vm6, %v1008_v18 }
 0x328   :  { %1790 = vmatpush3.bf16.msra.mxu0 %v1834_v60  ;;  %1797 = vmatprep.mubr.msk.bf16.mxu0 %vm1842_vm4, %v1841_v22  ;;  %vm1595_vm4 = vcmask 261120  }
 0x329   :  { %1791 = vmatprep.subr.bf16.mxu0 %v1841_v22 }
 0x32c   :  { %1792 = vmatpush3.bf16.msra.mxu0 %v1835_v47 }
 0x32d   :  { %1793 = vmatprep.subr.bf16.mxu0 %v1841_v22 }
 0x330   :  { %1794 = vmatpush3.bf16.msra.mxu0 %v1836_v61 }
 0x331   :  { %1795 = vmatprep.subr.bf16.mxu0 %v1841_v22 }
 0x334   :  { %1796 = vmatpush3.bf16.msra.mxu0 %v1837_v62 }
 0x3e7   :  { %v1070_v4 = vpop.f32.mrf.mxu0 }
 0x3e9   :  { %v1787_v37 = vpop.f32.mrf.mxu0 }
 0x3eb   :  { %v1073_v49 = vpop.f32.mrf.mxu0 }
 0x3ec   :  { %v1077_v0 = vadd.f32 %v1073_v49, %v1070_v4 }
 0x3ed   :  { %v1788_v1 = vpop.f32.mrf.mxu0 }
 0x3ee   :  { %v1083_v54 = vadd.f32 %v1712_v7, %v1077_v0 }
 0x3f0   :  { %v1481_v11 = vpack.c.bf16 %v2494_v15, %v1083_v54 }
 0x3f2   :  { %1798 = vmatmul.mubr.msk.bf16.vlgmr.msra.gmra.mxu0 %vm882_vm6, %v1481_v11 }
 0x4b2   :  { %v1548_v58 = vpop.f32.mrf.mxu0 }
 0x4b3   :  { %v1549_v15 = vadd.f32 %v1713_v55, %v1548_v58 }
 0x4b4   :  { %v1799_v17 = vpop.f32.mrf.mxu0 }
 0x4b5   :  { %v1555_v45 = vmul.f32 0.2, %v1549_v15 }
 0x4b6   :  { %v1551_v31 = vpop.f32.mrf.mxu0 }
 0x4b7   :  { %v1552_v12 = vadd.f32 %v1713_v55, %v1551_v31  ;;  %v1557_v27 = vmax.f32 %v1549_v15, %v1555_v45 }
 0x4b8   :  { %v1800_v19 = vpop.f32.mrf.mxu0 }
 0x4b9   :  { %v1556_v63 = vmul.f32 0.2, %v1552_v12 }
 0x4bb   :  { %v1558_v25 = vmax.f32 %v1552_v12, %v1556_v63 }
 0x4bd   :  { %1567 = vrot.lane.b32.xlu1 %v1558_v25, %s1844_s30 }
 0x52f   :  { %v1568_v28 = vpop.permute.xlu1 %1567 }
 0x530   :  { %v1577_v22 = vpack.c.bf16 %v1568_v28, %v1557_v27 }
 0x532   :  { %1806 = vmatmul.mubr.msk.bf16.vlgmr.msra.gmra.mxu1 %vm1595_vm4, %v1577_v22 }
 0x5f2   :  { %v1633_v6 = vpop.f32.mrf.mxu1 }
 0x5f3   :  { %v1634_v35 = vadd.f32 %v1719_v2, %v1633_v6 }
 0x5f4   :  { %v1807_v21 = vpop.f32.mrf.mxu1 }
 0x5f5   :  { %v1640_v29 = vmul.f32 0.2, %v1634_v35 }
 0x5f6   :  { %v1636_v14 = vpop.f32.mrf.mxu1 }
 0x5f7   :  { %v1637_v50 = vadd.f32 %v1719_v2, %v1636_v14  ;;  %v1642_v36 = vmax.f32 %v1634_v35, %v1640_v29 }
 0x5f8   :  { %v1808_v33 = vpop.f32.mrf.mxu1 }
 0x5f9   :  { %v1641_v9 = vmul.f32 0.2, %v1637_v50  ;;  %v1678_v26 = vmul.f32 %v1723_v24, %v1642_v36 }
 0x5fb   :  { %v1643_v34 = vmax.f32 %v1637_v50, %v1641_v9  ;;  %v1680_v10 = vsel %vm82_vm0, %v1678_v26, 0.0 }
 0x5fd   :  { %1648 = vrot.lane.b32.xlu1 %v1643_v34, %s1845_s6 }
 0x621   :  { %1681 = vadd.xlane.f32.xlu1 %v1680_v10 }
 0x66f   :  { %v1649_v40 = vpop.permute.xlu1 %1648 }
 0x670   :  { %v1679_v3 = vmul.f32 %v1724_v38, %v1649_v40 }
 0x672   :  { %v1683_v32 = vsel %vm82_vm0, %v1679_v3, 0.0 }
 0x673   :  { %1684 = vadd.xlane.f32.xlu0 %v1683_v32 }
 0x6aa   :  { %v1682_v41 = vpop.xlane.xlu1 %1681 }
 0x6ab   :  { %v1686_v42 = vadd.f32 %v1725_v51, %v1682_v41 }
 0x6ad   :  { %1689 = vst.msk [vmem:[%s2626_s4] sm:$0xff] %vm1688_vm7, %v1686_v42 }
 0x6fc   :  { %v1685_v48 = vpop.xlane.xlu0 %1684 }
 0x6fd   :  { %v1687_v52 = vadd.f32 %v1726_v20, %v1685_v48 }
 0x6ff   :  { %1690 = vst.msk [vmem:[%s2626_s4 + $0x8] sm:$0xff] %vm1688_vm7, %v1687_v52 }

</bundles_post_ra>
